<compile_context>
chip_gen: v5e
topology: v5e:2x2
jax: 0.10.0
libtpu: 0.0.40
codegen_flags: <defaults>
</compile_context>

<pallas_src>
import math
import functools

import jax
import jax.numpy as jnp
from jax.experimental import pallas as pl
from jax.experimental.pallas import tpu as pltpu

PARAM_ORDER = [
    "wq", "bq", "wk", "bk", "wv", "bv", "wo", "bo",
    "ln1_g", "ln1_b", "w1", "b1", "w2", "b2", "ln2_g", "ln2_b",
]


# ---------------------------------------------------------------------------
# Pallas kernel: the whole encoder stack; one grid step == one encoder layer.
# ---------------------------------------------------------------------------
def encoder_kernel(x_ref, bias_ref,
                   wq, bq, wk, bk, wv, bv, wo, bo,
                   ln1_g, ln1_b, w1, b1, w2, b2, ln2_g, ln2_b,
                   out_ref, act_ref, *, nheads, batch, seq):
    layer = pl.program_id(0)

    # Layer 0: load the embedding output into the resident VMEM activation buffer.
    @pl.when(layer == 0)
    def _():
        act_ref[...] = x_ref[...]

    x = act_ref[...]                     # (B*S, H), resident across layers
    bias = bias_ref[...]                 # (B, 1, S) additive mask bias (0 or -1e10)
    BS, H = x.shape
    hd = H // nheads
    inv_scale = 1.0 / math.sqrt(hd)

    def linear(t, w_r, b_r):
        return jnp.dot(t, w_r[0], preferred_element_type=jnp.float32) + b_r[0]

    def layer_norm(t, g_r, b_r):
        mu = jnp.mean(t, axis=-1, keepdims=True)
        var = jnp.mean((t - mu) * (t - mu), axis=-1, keepdims=True)
        return (t - mu) * jax.lax.rsqrt(var + 1e-5) * g_r[0] + b_r[0]

    # ---- multi-head self-attention (QKV on the full B*S slab) ----
    q = linear(x, wq, bq).reshape(batch, seq, H)
    k = linear(x, wk, bk).reshape(batch, seq, H)
    v = linear(x, wv, bv).reshape(batch, seq, H)

    wo_w = wo[0]                                             # (H, H)
    attn = jnp.zeros((BS, H), jnp.float32)
    for h in range(nheads):                                  # static unrolled over heads
        lo = h * hd
        qh = q[:, :, lo:lo + hd]                             # (B, S, hd)
        kh = k[:, :, lo:lo + hd]
        vh = v[:, :, lo:lo + hd]
        # batched over B; contraction over head_dim (no explicit transpose needed)
        e = jnp.einsum("bqd,bkd->bqk", qh, kh,
                       preferred_element_type=jnp.float32) * inv_scale     # (B, S, S)
        e = e + bias                                         # (B,1,S) broadcasts over queries
        e = e - jnp.max(e, axis=-1, keepdims=True)
        p = jnp.exp(e)
        p = p / jnp.sum(p, axis=-1, keepdims=True)
        oh = jnp.einsum("bqk,bkd->bqd", p, vh,
                        preferred_element_type=jnp.float32)                # (B, S, hd)
        # fold the output projection per head -> no concatenate needed
        attn = attn + jnp.dot(oh.reshape(BS, hd), wo_w[lo:lo + hd, :],
                              preferred_element_type=jnp.float32)
    attn = attn + bo[0]

    # ---- residual + layernorm ----
    x1 = layer_norm(x + attn, ln1_g, ln1_b)

    # ---- positionwise feed-forward ----
    ff = linear(jnp.maximum(linear(x1, w1, b1), 0.0), w2, b2)

    # ---- residual + layernorm ----
    y = layer_norm(x1 + ff, ln2_g, ln2_b)

    act_ref[...] = y                                         # carry to next layer (VMEM)

    @pl.when(layer == pl.num_programs(0) - 1)
    def _():
        out_ref[...] = y                                     # single HBM writeback


def encoder_pallas(x_emb, src_mask, stacked_params, nheads):
    """x_emb: (B, S, H) embedding output; src_mask: (B, S) with 1=attend, 0=pad."""
    B, S, H = x_emb.shape
    L = stacked_params[PARAM_ORDER[0]].shape[0]
    PF = stacked_params["w1"].shape[2]
    hd = H // nheads

    x2 = x_emb.reshape(B * S, H).astype(jnp.float32)
    # additive mask bias computed once (hoisted out of the head loop)
    bias = jnp.where(src_mask == 0.0, -1e10, 0.0).astype(jnp.float32)[:, None, :]

    plist = [stacked_params[k] for k in PARAM_ORDER]         # each (L, r, c)

    in_specs = [
        pl.BlockSpec((B * S, H), lambda l: (0, 0)),          # embedding slab (resident)
        pl.BlockSpec((B, 1, S), lambda l: (0, 0, 0)),        # mask bias (resident)
    ]
    for p in plist:
        in_specs.append(pl.BlockSpec((1,) + p.shape[1:], lambda l: (l, 0, 0)))

    flops_layer = (
        4 * 2 * (B * S) * H * H                 # q, k, v, o projections
        + 2 * 2 * B * nheads * S * S * hd       # scores + attn @ V
        + 2 * 2 * (B * S) * H * PF              # feed-forward
    )
    cost = pl.CostEstimate(
        flops=L * flops_layer,
        transcendentals=L * B * nheads * S * S,
        bytes_accessed=4 * (2 * x2.size + bias.size + sum(p.size for p in plist)),
    )

    kernel = functools.partial(encoder_kernel, nheads=nheads, batch=B, seq=S)
    out2 = pl.pallas_call(
        kernel,
        out_shape=jax.ShapeDtypeStruct((B * S, H), jnp.float32),
        grid=(L,),
        in_specs=in_specs,
        out_specs=pl.BlockSpec((B * S, H), lambda l: (0, 0)),
        scratch_shapes=[pltpu.VMEM((B * S, H), jnp.float32)],   # activation carry
        compiler_params=pltpu.CompilerParams(dimension_semantics=("arbitrary",)),
        cost_estimate=cost,
    )(x2, bias, *plist)
    return out2.reshape(B, S, H)


# ---------------------------------------------------------------------------
# Pure-JAX reference of one EncoderLayer (for the correctness check).
# ---------------------------------------------------------------------------
def encoder_layer_ref(x, mask, p, nheads):
    B, S, H = x.shape
    hd = H // nheads

    def lin(t, w, b):
        return t @ w + b

    def ln(t, g, b):
        mu = t.mean(-1, keepdims=True)
        var = ((t - mu) ** 2).mean(-1, keepdims=True)
        return (t - mu) / jnp.sqrt(var + 1e-5) * g + b

    def split(t):
        return t.reshape(B, S, nheads, hd).transpose(0, 2, 1, 3)

    q = split(lin(x, p["wq"], p["bq"]))
    k = split(lin(x, p["wk"], p["bk"]))
    v = split(lin(x, p["wv"], p["bv"]))
    e = jnp.einsum("bhqd,bhkd->bhqk", q, k) / math.sqrt(hd)
    e = jnp.where(mask[:, None, None, :] == 0.0, -1e10, e)
    a = jax.nn.softmax(e, axis=-1)
    o = jnp.einsum("bhqk,bhkd->bhqd", a, v).transpose(0, 2, 1, 3).reshape(B, S, H)
    o = lin(o, p["wo"], p["bo"])
    x1 = ln(x + o, p["ln1_g"], p["ln1_b"])
    ff = lin(jax.nn.relu(lin(x1, p["w1"], p["b1"])), p["w2"], p["b2"])
    return ln(x1 + ff, p["ln2_g"], p["ln2_b"])


# ---------------------------------------------------------------------------
# Deterministic parameter init (weights stored as (in, out), i.e. W^T of torch).
# ---------------------------------------------------------------------------
def init_layer_params(key, nhid, pfdim):
    ks = jax.random.split(key, 12)

    def w(k, shape):
        return jax.random.normal(k, shape, jnp.float32) * 0.05

    return dict(
        wq=w(ks[0], (nhid, nhid)), bq=w(ks[1], (1, nhid)),
        wk=w(ks[2], (nhid, nhid)), bk=w(ks[3], (1, nhid)),
        wv=w(ks[4], (nhid, nhid)), bv=w(ks[5], (1, nhid)),
        wo=w(ks[6], (nhid, nhid)), bo=w(ks[7], (1, nhid)),
        ln1_g=jnp.ones((1, nhid), jnp.float32),
        ln1_b=jnp.zeros((1, nhid), jnp.float32),
        w1=w(ks[8], (nhid, pfdim)), b1=w(ks[9], (1, pfdim)),
        w2=w(ks[10], (pfdim, nhid)), b2=w(ks[11], (1, nhid)),
        ln2_g=jnp.ones((1, nhid), jnp.float32),
        ln2_b=jnp.zeros((1, nhid), jnp.float32),
    )


if __name__ == "__main__":
    B, S = 2, 8
    NINP, NHID, NLAYERS, NHEADS, PFDIM, MAX_LEN = 50, 32, 2, 4, 64, 100

    key = jax.random.PRNGKey(0)
    k_tok, k_pos, k_src, *k_layers = jax.random.split(key, 3 + NLAYERS)

    tok_emb = jax.random.normal(k_tok, (NINP, NHID), jnp.float32) * 0.1
    pos_emb = jax.random.normal(k_pos, (MAX_LEN, NHID), jnp.float32) * 0.1
    src = jax.random.randint(k_src, (B, S), 0, NINP)                 # token ids (B, S)
    # src_mask: 1.0 = attend, 0.0 = padding (torch: (src != pad)[:, None, None, :])
    src_mask = jnp.ones((B, S), jnp.float32).at[1, 6:].set(0.0)

    layer_params = [init_layer_params(k, NHID, PFDIM) for k in k_layers]
    stacked = {k: jnp.stack([p[k] for p in layer_params]) for k in PARAM_ORDER}

    # Embedding glue in plain JAX (gather), then the fused Pallas encoder stack.
    pos = jnp.arange(S)
    x_emb = tok_emb[src] * math.sqrt(NHID) + pos_emb[pos][None, :, :]    # (B, S, H)

    out = encoder_pallas(x_emb, src_mask, stacked, NHEADS)
    out = jax.block_until_ready(out)

    # pure-JAX reference
    ref = x_emb
    for p in layer_params:
        ref = encoder_layer_ref(ref, src_mask, p, NHEADS)

    assert out.shape == (B, S, NHID)
    assert jnp.allclose(out, ref, atol=2e-2, rtol=2e-2), "mismatch vs pure-JAX reference"
    print("KERNEL_OK")
</pallas_src>

<mosaic_0001>
module attributes {stable_mosaic.version = 11 : i64} {
  func.func @encoder_kernel(%arg0: i32, %arg1: memref<16x32xf32, #tpu.memory_space<vmem>>, %arg2: memref<2x1x8xf32, #tpu.memory_space<vmem>>, %arg3: memref<1x32x32xf32, #tpu.memory_space<vmem>>, %arg4: memref<1x1x32xf32, #tpu.memory_space<vmem>>, %arg5: memref<1x32x32xf32, #tpu.memory_space<vmem>>, %arg6: memref<1x1x32xf32, #tpu.memory_space<vmem>>, %arg7: memref<1x32x32xf32, #tpu.memory_space<vmem>>, %arg8: memref<1x1x32xf32, #tpu.memory_space<vmem>>, %arg9: memref<1x32x32xf32, #tpu.memory_space<vmem>>, %arg10: memref<1x1x32xf32, #tpu.memory_space<vmem>>, %arg11: memref<1x1x32xf32, #tpu.memory_space<vmem>>, %arg12: memref<1x1x32xf32, #tpu.memory_space<vmem>>, %arg13: memref<1x32x64xf32, #tpu.memory_space<vmem>>, %arg14: memref<1x1x64xf32, #tpu.memory_space<vmem>>, %arg15: memref<1x64x32xf32, #tpu.memory_space<vmem>>, %arg16: memref<1x1x32xf32, #tpu.memory_space<vmem>>, %arg17: memref<1x1x32xf32, #tpu.memory_space<vmem>>, %arg18: memref<1x1x32xf32, #tpu.memory_space<vmem>>, %arg19: memref<16x32xf32, #tpu.memory_space<vmem>>, %arg20: memref<16x32xf32, #tpu.memory_space<vmem>>) attributes {dimension_semantics = [#tpu.dimension_semantics<arbitrary>], iteration_bounds = array<i64: 2>, scalar_prefetch = 0 : i64, scratch_operands = 1 : i64, tpu.core_type = #tpu.core_type<tc>, window_params = [{pipeline_mode = #tpu.pipeline_mode<synchronous>, transform_indices = @transform_0, window_bounds = array<i64: 16, 32>}, {pipeline_mode = #tpu.pipeline_mode<synchronous>, transform_indices = @transform_1, window_bounds = array<i64: 2, 1, 8>}, {transform_indices = @transform_2, window_bounds = array<i64: 1, 32, 32>}, {transform_indices = @transform_3, window_bounds = array<i64: 1, 1, 32>}, {transform_indices = @transform_4, window_bounds = array<i64: 1, 32, 32>}, {transform_indices = @transform_5, window_bounds = array<i64: 1, 1, 32>}, {transform_indices = @transform_6, window_bounds = array<i64: 1, 32, 32>}, {transform_indices = @transform_7, window_bounds = array<i64: 1, 1, 32>}, {transform_indices = @transform_8, window_bounds = array<i64: 1, 32, 32>}, {transform_indices = @transform_9, window_bounds = array<i64: 1, 1, 32>}, {transform_indices = @transform_10, window_bounds = array<i64: 1, 1, 32>}, {transform_indices = @transform_11, window_bounds = array<i64: 1, 1, 32>}, {transform_indices = @transform_12, window_bounds = array<i64: 1, 32, 64>}, {transform_indices = @transform_13, window_bounds = array<i64: 1, 1, 64>}, {transform_indices = @transform_14, window_bounds = array<i64: 1, 64, 32>}, {transform_indices = @transform_15, window_bounds = array<i64: 1, 1, 32>}, {transform_indices = @transform_16, window_bounds = array<i64: 1, 1, 32>}, {transform_indices = @transform_17, window_bounds = array<i64: 1, 1, 32>}, {pipeline_mode = #tpu.pipeline_mode<synchronous>, transform_indices = @transform_18, window_bounds = array<i64: 16, 32>}]} {
    %c0_i32 = arith.constant 0 : i32
    %0 = arith.cmpi eq, %arg0, %c0_i32 : i32
    %1 = arith.extui %0 : i1 to i32
    %c0_i32_0 = arith.constant 0 : i32
    %2 = arith.cmpi ne, %1, %c0_i32_0 : i32
    scf.if %2 {
      %c0_96 = arith.constant 0 : index
      %c0_97 = arith.constant 0 : index
      %202 = vector.load %arg1[%c0_96, %c0_97] : memref<16x32xf32, #tpu.memory_space<vmem>>, vector<16x32xf32>
      %c0_98 = arith.constant 0 : index
      %c0_99 = arith.constant 0 : index
      %203 = vector.load %arg20[%c0_98, %c0_99] : memref<16x32xf32, #tpu.memory_space<vmem>>, vector<16x32xf32>
      tpu.vector_store %arg20[%c0_98, %c0_99], %202 {strides = array<i32>} : memref<16x32xf32, #tpu.memory_space<vmem>>, vector<16x32xf32>,
    } else {
    }
    %c0 = arith.constant 0 : index
    %c0_1 = arith.constant 0 : index
    %3 = vector.load %arg20[%c0, %c0_1] : memref<16x32xf32, #tpu.memory_space<vmem>>, vector<16x32xf32>
    %c0_2 = arith.constant 0 : index
    %c0_3 = arith.constant 0 : index
    %c0_4 = arith.constant 0 : index
    %4 = vector.load %arg2[%c0_2, %c0_3, %c0_4] : memref<2x1x8xf32, #tpu.memory_space<vmem>>, vector<2x1x8xf32>
    %c0_5 = arith.constant 0 : index
    %c0_6 = arith.constant 0 : index
    %c0_7 = arith.constant 0 : index
    %5 = vector.load %arg3[%c0_5, %c0_6, %c0_7] : memref<1x32x32xf32, #tpu.memory_space<vmem>>, vector<1x32x32xf32>
    %6 = vector.shape_cast %5 : vector<1x32x32xf32> to vector<32x32xf32>
    %cst = arith.constant dense<0.000000e+00> : vector<16x32xf32>
    %7 = tpu.matmul %3, %6, %cst {dimension_numbers = #tpu.dot_dimension_numbers<[1], [0], [0], [1], [0, 0, 1, 1], [], []>} : vector<16x32xf32>, vector<32x32xf32>, vector<16x32xf32> -> vector<16x32xf32>
    %c0_8 = arith.constant 0 : index
    %c0_9 = arith.constant 0 : index
    %c0_10 = arith.constant 0 : index
    %8 = vector.load %arg4[%c0_8, %c0_9, %c0_10] : memref<1x1x32xf32, #tpu.memory_space<vmem>>, vector<1x1x32xf32>
    %9 = vector.shape_cast %8 : vector<1x1x32xf32> to vector<1x32xf32>
    %10 = vector.broadcast %9 : vector<1x32xf32> to vector<16x32xf32>
    %11 = arith.addf %7, %10 : vector<16x32xf32>
    %12 = vector.shape_cast %11 : vector<16x32xf32> to vector<2x8x32xf32>
    %c0_11 = arith.constant 0 : index
    %c0_12 = arith.constant 0 : index
    %c0_13 = arith.constant 0 : index
    %13 = vector.load %arg5[%c0_11, %c0_12, %c0_13] : memref<1x32x32xf32, #tpu.memory_space<vmem>>, vector<1x32x32xf32>
    %14 = vector.shape_cast %13 : vector<1x32x32xf32> to vector<32x32xf32>
    %cst_14 = arith.constant dense<0.000000e+00> : vector<16x32xf32>
    %15 = tpu.matmul %3, %14, %cst_14 {dimension_numbers = #tpu.dot_dimension_numbers<[1], [0], [0], [1], [0, 0, 1, 1], [], []>} : vector<16x32xf32>, vector<32x32xf32>, vector<16x32xf32> -> vector<16x32xf32>
    %c0_15 = arith.constant 0 : index
    %c0_16 = arith.constant 0 : index
    %c0_17 = arith.constant 0 : index
    %16 = vector.load %arg6[%c0_15, %c0_16, %c0_17] : memref<1x1x32xf32, #tpu.memory_space<vmem>>, vector<1x1x32xf32>
    %17 = vector.shape_cast %16 : vector<1x1x32xf32> to vector<1x32xf32>
    %18 = vector.broadcast %17 : vector<1x32xf32> to vector<16x32xf32>
    %19 = arith.addf %15, %18 : vector<16x32xf32>
    %20 = vector.shape_cast %19 : vector<16x32xf32> to vector<2x8x32xf32>
    %c0_18 = arith.constant 0 : index
    %c0_19 = arith.constant 0 : index
    %c0_20 = arith.constant 0 : index
    %21 = vector.load %arg7[%c0_18, %c0_19, %c0_20] : memref<1x32x32xf32, #tpu.memory_space<vmem>>, vector<1x32x32xf32>
    %22 = vector.shape_cast %21 : vector<1x32x32xf32> to vector<32x32xf32>
    %cst_21 = arith.constant dense<0.000000e+00> : vector<16x32xf32>
    %23 = tpu.matmul %3, %22, %cst_21 {dimension_numbers = #tpu.dot_dimension_numbers<[1], [0], [0], [1], [0, 0, 1, 1], [], []>} : vector<16x32xf32>, vector<32x32xf32>, vector<16x32xf32> -> vector<16x32xf32>
    %c0_22 = arith.constant 0 : index
    %c0_23 = arith.constant 0 : index
    %c0_24 = arith.constant 0 : index
    %24 = vector.load %arg8[%c0_22, %c0_23, %c0_24] : memref<1x1x32xf32, #tpu.memory_space<vmem>>, vector<1x1x32xf32>
    %25 = vector.shape_cast %24 : vector<1x1x32xf32> to vector<1x32xf32>
    %26 = vector.broadcast %25 : vector<1x32xf32> to vector<16x32xf32>
    %27 = arith.addf %23, %26 : vector<16x32xf32>
    %28 = vector.shape_cast %27 : vector<16x32xf32> to vector<2x8x32xf32>
    %c0_25 = arith.constant 0 : index
    %c0_26 = arith.constant 0 : index
    %c0_27 = arith.constant 0 : index
    %29 = vector.load %arg9[%c0_25, %c0_26, %c0_27] : memref<1x32x32xf32, #tpu.memory_space<vmem>>, vector<1x32x32xf32>
    %30 = vector.shape_cast %29 : vector<1x32x32xf32> to vector<32x32xf32>
    %cst_28 = arith.constant 0.000000e+00 : f32
    %31 = vector.broadcast %cst_28 : f32 to vector<16x32xf32>
    %32 = vector.extract_strided_slice %12 {offsets = [0, 0, 0], sizes = [2, 8, 8], strides = [1, 1, 1]} : vector<2x8x32xf32> to vector<2x8x8xf32>
    %33 = vector.extract_strided_slice %20 {offsets = [0, 0, 0], sizes = [2, 8, 8], strides = [1, 1, 1]} : vector<2x8x32xf32> to vector<2x8x8xf32>
    %34 = vector.extract_strided_slice %28 {offsets = [0, 0, 0], sizes = [2, 8, 8], strides = [1, 1, 1]} : vector<2x8x32xf32> to vector<2x8x8xf32>
    "tpu.trace_start"() <{level = 10 : i32, message = "bqd,bkd->bqk"}> : () -> ()
    %cst_29 = arith.constant dense<0.000000e+00> : vector<2x8x8xf32>
    %35 = tpu.matmul %32, %33, %cst_29 {dimension_numbers = #tpu.dot_dimension_numbers<[2], [2], [1], [1], [0, 0, 0, 1, 1, 1], [0], [0]>} : vector<2x8x8xf32>, vector<2x8x8xf32>, vector<2x8x8xf32> -> vector<2x8x8xf32>
    "tpu.trace_stop"() : () -> ()
    %cst_30 = arith.constant 0.353553385 : f32
    %36 = vector.broadcast %cst_30 : f32 to vector<2x8x8xf32>
    %37 = arith.mulf %35, %36 : vector<2x8x8xf32>
    %38 = vector.broadcast %4 : vector<2x1x8xf32> to vector<2x8x8xf32>
    %39 = arith.addf %37, %38 : vector<2x8x8xf32>
    %cst_31 = arith.constant dense<0xFF800000> : vector<2x8xf32>
    %40 = vector.multi_reduction <maximumf>, %39, %cst_31 [2] : vector<2x8x8xf32> to vector<2x8xf32>
    %41 = vector.shape_cast %40 : vector<2x8xf32> to vector<2x8x1xf32>
    %42 = vector.broadcast %41 : vector<2x8x1xf32> to vector<2x8x8xf32>
    %43 = arith.subf %39, %42 : vector<2x8x8xf32>
    %44 = math.exp %43 : vector<2x8x8xf32>
    %cst_32 = arith.constant dense<0.000000e+00> : vector<2x8xf32>
    %45 = vector.multi_reduction <add>, %44, %cst_32 [2] : vector<2x8x8xf32> to vector<2x8xf32>
    %46 = vector.shape_cast %45 : vector<2x8xf32> to vector<2x8x1xf32>
    %47 = vector.broadcast %46 : vector<2x8x1xf32> to vector<2x8x8xf32>
    %48 = arith.divf %44, %47 : vector<2x8x8xf32>
    "tpu.trace_start"() <{level = 10 : i32, message = "bqk,bkd->bqd"}> : () -> ()
    %cst_33 = arith.constant dense<0.000000e+00> : vector<2x8x8xf32>
    %49 = tpu.matmul %48, %34, %cst_33 {dimension_numbers = #tpu.dot_dimension_numbers<[2], [1], [1], [2], [0, 0, 0, 1, 1, 2], [0], [0]>} : vector<2x8x8xf32>, vector<2x8x8xf32>, vector<2x8x8xf32> -> vector<2x8x8xf32>
    "tpu.trace_stop"() : () -> ()
    %50 = vector.shape_cast %49 : vector<2x8x8xf32> to vector<16x8xf32>
    %51 = vector.extract_strided_slice %30 {offsets = [0, 0], sizes = [8, 32], strides = [1, 1]} : vector<32x32xf32> to vector<8x32xf32>
    %cst_34 = arith.constant dense<0.000000e+00> : vector<16x32xf32>
    %52 = tpu.matmul %50, %51, %cst_34 {dimension_numbers = #tpu.dot_dimension_numbers<[1], [0], [0], [1], [0, 0, 1, 1], [], []>} : vector<16x8xf32>, vector<8x32xf32>, vector<16x32xf32> -> vector<16x32xf32>
    %53 = arith.addf %31, %52 : vector<16x32xf32>
    %54 = vector.extract_strided_slice %12 {offsets = [0, 0, 8], sizes = [2, 8, 8], strides = [1, 1, 1]} : vector<2x8x32xf32> to vector<2x8x8xf32>
    %55 = vector.extract_strided_slice %20 {offsets = [0, 0, 8], sizes = [2, 8, 8], strides = [1, 1, 1]} : vector<2x8x32xf32> to vector<2x8x8xf32>
    %56 = vector.extract_strided_slice %28 {offsets = [0, 0, 8], sizes = [2, 8, 8], strides = [1, 1, 1]} : vector<2x8x32xf32> to vector<2x8x8xf32>
    "tpu.trace_start"() <{level = 10 : i32, message = "bqd,bkd->bqk"}> : () -> ()
    %cst_35 = arith.constant dense<0.000000e+00> : vector<2x8x8xf32>
    %57 = tpu.matmul %54, %55, %cst_35 {dimension_numbers = #tpu.dot_dimension_numbers<[2], [2], [1], [1], [0, 0, 0, 1, 1, 1], [0], [0]>} : vector<2x8x8xf32>, vector<2x8x8xf32>, vector<2x8x8xf32> -> vector<2x8x8xf32>
    "tpu.trace_stop"() : () -> ()
    %cst_36 = arith.constant 0.353553385 : f32
    %58 = vector.broadcast %cst_36 : f32 to vector<2x8x8xf32>
    %59 = arith.mulf %57, %58 : vector<2x8x8xf32>
    %60 = vector.broadcast %4 : vector<2x1x8xf32> to vector<2x8x8xf32>
    %61 = arith.addf %59, %60 : vector<2x8x8xf32>
    %cst_37 = arith.constant dense<0xFF800000> : vector<2x8xf32>
    %62 = vector.multi_reduction <maximumf>, %61, %cst_37 [2] : vector<2x8x8xf32> to vector<2x8xf32>
    %63 = vector.shape_cast %62 : vector<2x8xf32> to vector<2x8x1xf32>
    %64 = vector.broadcast %63 : vector<2x8x1xf32> to vector<2x8x8xf32>
    %65 = arith.subf %61, %64 : vector<2x8x8xf32>
    %66 = math.exp %65 : vector<2x8x8xf32>
    %cst_38 = arith.constant dense<0.000000e+00> : vector<2x8xf32>
    %67 = vector.multi_reduction <add>, %66, %cst_38 [2] : vector<2x8x8xf32> to vector<2x8xf32>
    %68 = vector.shape_cast %67 : vector<2x8xf32> to vector<2x8x1xf32>
    %69 = vector.broadcast %68 : vector<2x8x1xf32> to vector<2x8x8xf32>
    %70 = arith.divf %66, %69 : vector<2x8x8xf32>
    "tpu.trace_start"() <{level = 10 : i32, message = "bqk,bkd->bqd"}> : () -> ()
    %cst_39 = arith.constant dense<0.000000e+00> : vector<2x8x8xf32>
    %71 = tpu.matmul %70, %56, %cst_39 {dimension_numbers = #tpu.dot_dimension_numbers<[2], [1], [1], [2], [0, 0, 0, 1, 1, 2], [0], [0]>} : vector<2x8x8xf32>, vector<2x8x8xf32>, vector<2x8x8xf32> -> vector<2x8x8xf32>
    "tpu.trace_stop"() : () -> ()
    %72 = vector.shape_cast %71 : vector<2x8x8xf32> to vector<16x8xf32>
    %73 = vector.extract_strided_slice %30 {offsets = [8, 0], sizes = [8, 32], strides = [1, 1]} : vector<32x32xf32> to vector<8x32xf32>
    %cst_40 = arith.constant dense<0.000000e+00> : vector<16x32xf32>
    %74 = tpu.matmul %72, %73, %cst_40 {dimension_numbers = #tpu.dot_dimension_numbers<[1], [0], [0], [1], [0, 0, 1, 1], [], []>} : vector<16x8xf32>, vector<8x32xf32>, vector<16x32xf32> -> vector<16x32xf32>
    %75 = arith.addf %53, %74 : vector<16x32xf32>
    %76 = vector.extract_strided_slice %12 {offsets = [0, 0, 16], sizes = [2, 8, 8], strides = [1, 1, 1]} : vector<2x8x32xf32> to vector<2x8x8xf32>
    %77 = vector.extract_strided_slice %20 {offsets = [0, 0, 16], sizes = [2, 8, 8], strides = [1, 1, 1]} : vector<2x8x32xf32> to vector<2x8x8xf32>
    %78 = vector.extract_strided_slice %28 {offsets = [0, 0, 16], sizes = [2, 8, 8], strides = [1, 1, 1]} : vector<2x8x32xf32> to vector<2x8x8xf32>
    "tpu.trace_start"() <{level = 10 : i32, message = "bqd,bkd->bqk"}> : () -> ()
    %cst_41 = arith.constant dense<0.000000e+00> : vector<2x8x8xf32>
    %79 = tpu.matmul %76, %77, %cst_41 {dimension_numbers = #tpu.dot_dimension_numbers<[2], [2], [1], [1], [0, 0, 0, 1, 1, 1], [0], [0]>} : vector<2x8x8xf32>, vector<2x8x8xf32>, vector<2x8x8xf32> -> vector<2x8x8xf32>
    "tpu.trace_stop"() : () -> ()
    %cst_42 = arith.constant 0.353553385 : f32
    %80 = vector.broadcast %cst_42 : f32 to vector<2x8x8xf32>
    %81 = arith.mulf %79, %80 : vector<2x8x8xf32>
    %82 = vector.broadcast %4 : vector<2x1x8xf32> to vector<2x8x8xf32>
    %83 = arith.addf %81, %82 : vector<2x8x8xf32>
    %cst_43 = arith.constant dense<0xFF800000> : vector<2x8xf32>
    %84 = vector.multi_reduction <maximumf>, %83, %cst_43 [2] : vector<2x8x8xf32> to vector<2x8xf32>
    %85 = vector.shape_cast %84 : vector<2x8xf32> to vector<2x8x1xf32>
    %86 = vector.broadcast %85 : vector<2x8x1xf32> to vector<2x8x8xf32>
    %87 = arith.subf %83, %86 : vector<2x8x8xf32>
    %88 = math.exp %87 : vector<2x8x8xf32>
    %cst_44 = arith.constant dense<0.000000e+00> : vector<2x8xf32>
    %89 = vector.multi_reduction <add>, %88, %cst_44 [2] : vector<2x8x8xf32> to vector<2x8xf32>
    %90 = vector.shape_cast %89 : vector<2x8xf32> to vector<2x8x1xf32>
    %91 = vector.broadcast %90 : vector<2x8x1xf32> to vector<2x8x8xf32>
    %92 = arith.divf %88, %91 : vector<2x8x8xf32>
    "tpu.trace_start"() <{level = 10 : i32, message = "bqk,bkd->bqd"}> : () -> ()
    %cst_45 = arith.constant dense<0.000000e+00> : vector<2x8x8xf32>
    %93 = tpu.matmul %92, %78, %cst_45 {dimension_numbers = #tpu.dot_dimension_numbers<[2], [1], [1], [2], [0, 0, 0, 1, 1, 2], [0], [0]>} : vector<2x8x8xf32>, vector<2x8x8xf32>, vector<2x8x8xf32> -> vector<2x8x8xf32>
    "tpu.trace_stop"() : () -> ()
    %94 = vector.shape_cast %93 : vector<2x8x8xf32> to vector<16x8xf32>
    %95 = vector.extract_strided_slice %30 {offsets = [16, 0], sizes = [8, 32], strides = [1, 1]} : vector<32x32xf32> to vector<8x32xf32>
    %cst_46 = arith.constant dense<0.000000e+00> : vector<16x32xf32>
    %96 = tpu.matmul %94, %95, %cst_46 {dimension_numbers = #tpu.dot_dimension_numbers<[1], [0], [0], [1], [0, 0, 1, 1], [], []>} : vector<16x8xf32>, vector<8x32xf32>, vector<16x32xf32> -> vector<16x32xf32>
    %97 = arith.addf %75, %96 : vector<16x32xf32>
    %98 = vector.extract_strided_slice %12 {offsets = [0, 0, 24], sizes = [2, 8, 8], strides = [1, 1, 1]} : vector<2x8x32xf32> to vector<2x8x8xf32>
    %99 = vector.extract_strided_slice %20 {offsets = [0, 0, 24], sizes = [2, 8, 8], strides = [1, 1, 1]} : vector<2x8x32xf32> to vector<2x8x8xf32>
    %100 = vector.extract_strided_slice %28 {offsets = [0, 0, 24], sizes = [2, 8, 8], strides = [1, 1, 1]} : vector<2x8x32xf32> to vector<2x8x8xf32>
    "tpu.trace_start"() <{level = 10 : i32, message = "bqd,bkd->bqk"}> : () -> ()
    %cst_47 = arith.constant dense<0.000000e+00> : vector<2x8x8xf32>
    %101 = tpu.matmul %98, %99, %cst_47 {dimension_numbers = #tpu.dot_dimension_numbers<[2], [2], [1], [1], [0, 0, 0, 1, 1, 1], [0], [0]>} : vector<2x8x8xf32>, vector<2x8x8xf32>, vector<2x8x8xf32> -> vector<2x8x8xf32>
    "tpu.trace_stop"() : () -> ()
    %cst_48 = arith.constant 0.353553385 : f32
    %102 = vector.broadcast %cst_48 : f32 to vector<2x8x8xf32>
    %103 = arith.mulf %101, %102 : vector<2x8x8xf32>
    %104 = vector.broadcast %4 : vector<2x1x8xf32> to vector<2x8x8xf32>
    %105 = arith.addf %103, %104 : vector<2x8x8xf32>
    %cst_49 = arith.constant dense<0xFF800000> : vector<2x8xf32>
    %106 = vector.multi_reduction <maximumf>, %105, %cst_49 [2] : vector<2x8x8xf32> to vector<2x8xf32>
    %107 = vector.shape_cast %106 : vector<2x8xf32> to vector<2x8x1xf32>
    %108 = vector.broadcast %107 : vector<2x8x1xf32> to vector<2x8x8xf32>
    %109 = arith.subf %105, %108 : vector<2x8x8xf32>
    %110 = math.exp %109 : vector<2x8x8xf32>
    %cst_50 = arith.constant dense<0.000000e+00> : vector<2x8xf32>
    %111 = vector.multi_reduction <add>, %110, %cst_50 [2] : vector<2x8x8xf32> to vector<2x8xf32>
    %112 = vector.shape_cast %111 : vector<2x8xf32> to vector<2x8x1xf32>
    %113 = vector.broadcast %112 : vector<2x8x1xf32> to vector<2x8x8xf32>
    %114 = arith.divf %110, %113 : vector<2x8x8xf32>
    "tpu.trace_start"() <{level = 10 : i32, message = "bqk,bkd->bqd"}> : () -> ()
    %cst_51 = arith.constant dense<0.000000e+00> : vector<2x8x8xf32>
    %115 = tpu.matmul %114, %100, %cst_51 {dimension_numbers = #tpu.dot_dimension_numbers<[2], [1], [1], [2], [0, 0, 0, 1, 1, 2], [0], [0]>} : vector<2x8x8xf32>, vector<2x8x8xf32>, vector<2x8x8xf32> -> vector<2x8x8xf32>
    "tpu.trace_stop"() : () -> ()
    %116 = vector.shape_cast %115 : vector<2x8x8xf32> to vector<16x8xf32>
    %117 = vector.extract_strided_slice %30 {offsets = [24, 0], sizes = [8, 32], strides = [1, 1]} : vector<32x32xf32> to vector<8x32xf32>
    %cst_52 = arith.constant dense<0.000000e+00> : vector<16x32xf32>
    %118 = tpu.matmul %116, %117, %cst_52 {dimension_numbers = #tpu.dot_dimension_numbers<[1], [0], [0], [1], [0, 0, 1, 1], [], []>} : vector<16x8xf32>, vector<8x32xf32>, vector<16x32xf32> -> vector<16x32xf32>
    %119 = arith.addf %97, %118 : vector<16x32xf32>
    %c0_53 = arith.constant 0 : index
    %c0_54 = arith.constant 0 : index
    %c0_55 = arith.constant 0 : index
    %120 = vector.load %arg10[%c0_53, %c0_54, %c0_55] : memref<1x1x32xf32, #tpu.memory_space<vmem>>, vector<1x1x32xf32>
    %121 = vector.shape_cast %120 : vector<1x1x32xf32> to vector<1x32xf32>
    %122 = vector.broadcast %121 : vector<1x32xf32> to vector<16x32xf32>
    %123 = arith.addf %119, %122 : vector<16x32xf32>
    %124 = arith.addf %3, %123 : vector<16x32xf32>
    %cst_56 = arith.constant dense<0.000000e+00> : vector<16xf32>
    %125 = vector.multi_reduction <add>, %124, %cst_56 [1] : vector<16x32xf32> to vector<16xf32>
    %126 = vector.shape_cast %125 : vector<16xf32> to vector<16x1xf32>
    %cst_57 = arith.constant 3.200000e+01 : f32
    %127 = vector.broadcast %cst_57 : f32 to vector<16x1xf32>
    %128 = arith.divf %126, %127 : vector<16x1xf32>
    %129 = vector.broadcast %128 : vector<16x1xf32> to vector<16x32xf32>
    %130 = arith.subf %124, %129 : vector<16x32xf32>
    %131 = vector.broadcast %128 : vector<16x1xf32> to vector<16x32xf32>
    %132 = arith.subf %124, %131 : vector<16x32xf32>
    %133 = arith.mulf %130, %132 : vector<16x32xf32>
    %cst_58 = arith.constant dense<0.000000e+00> : vector<16xf32>
    %134 = vector.multi_reduction <add>, %133, %cst_58 [1] : vector<16x32xf32> to vector<16xf32>
    %135 = vector.shape_cast %134 : vector<16xf32> to vector<16x1xf32>
    %cst_59 = arith.constant 3.200000e+01 : f32
    %136 = vector.broadcast %cst_59 : f32 to vector<16x1xf32>
    %137 = arith.divf %135, %136 : vector<16x1xf32>
    %138 = vector.broadcast %128 : vector<16x1xf32> to vector<16x32xf32>
    %139 = arith.subf %124, %138 : vector<16x32xf32>
    %cst_60 = arith.constant 9.99999974E-6 : f32
    %140 = vector.broadcast %cst_60 : f32 to vector<16x1xf32>
    %141 = arith.addf %137, %140 : vector<16x1xf32>
    %142 = math.rsqrt %141 : vector<16x1xf32>
    %143 = vector.broadcast %142 : vector<16x1xf32> to vector<16x32xf32>
    %144 = arith.mulf %139, %143 : vector<16x32xf32>
    %c0_61 = arith.constant 0 : index
    %c0_62 = arith.constant 0 : index
    %c0_63 = arith.constant 0 : index
    %145 = vector.load %arg11[%c0_61, %c0_62, %c0_63] : memref<1x1x32xf32, #tpu.memory_space<vmem>>, vector<1x1x32xf32>
    %146 = vector.shape_cast %145 : vector<1x1x32xf32> to vector<1x32xf32>
    %147 = vector.broadcast %146 : vector<1x32xf32> to vector<16x32xf32>
    %148 = arith.mulf %144, %147 : vector<16x32xf32>
    %c0_64 = arith.constant 0 : index
    %c0_65 = arith.constant 0 : index
    %c0_66 = arith.constant 0 : index
    %149 = vector.load %arg12[%c0_64, %c0_65, %c0_66] : memref<1x1x32xf32, #tpu.memory_space<vmem>>, vector<1x1x32xf32>
    %150 = vector.shape_cast %149 : vector<1x1x32xf32> to vector<1x32xf32>
    %151 = vector.broadcast %150 : vector<1x32xf32> to vector<16x32xf32>
    %152 = arith.addf %148, %151 : vector<16x32xf32>
    %c0_67 = arith.constant 0 : index
    %c0_68 = arith.constant 0 : index
    %c0_69 = arith.constant 0 : index
    %153 = vector.load %arg13[%c0_67, %c0_68, %c0_69] : memref<1x32x64xf32, #tpu.memory_space<vmem>>, vector<1x32x64xf32>
    %154 = vector.shape_cast %153 : vector<1x32x64xf32> to vector<32x64xf32>
    %cst_70 = arith.constant dense<0.000000e+00> : vector<16x64xf32>
    %155 = tpu.matmul %152, %154, %cst_70 {dimension_numbers = #tpu.dot_dimension_numbers<[1], [0], [0], [1], [0, 0, 1, 1], [], []>} : vector<16x32xf32>, vector<32x64xf32>, vector<16x64xf32> -> vector<16x64xf32>
    %c0_71 = arith.constant 0 : index
    %c0_72 = arith.constant 0 : index
    %c0_73 = arith.constant 0 : index
    %156 = vector.load %arg14[%c0_71, %c0_72, %c0_73] : memref<1x1x64xf32, #tpu.memory_space<vmem>>, vector<1x1x64xf32>
    %157 = vector.shape_cast %156 : vector<1x1x64xf32> to vector<1x64xf32>
    %158 = vector.broadcast %157 : vector<1x64xf32> to vector<16x64xf32>
    %159 = arith.addf %155, %158 : vector<16x64xf32>
    %cst_74 = arith.constant 0.000000e+00 : f32
    %160 = vector.broadcast %cst_74 : f32 to vector<16x64xf32>
    %161 = arith.maximumf %159, %160 : vector<16x64xf32>
    %c0_75 = arith.constant 0 : index
    %c0_76 = arith.constant 0 : index
    %c0_77 = arith.constant 0 : index
    %162 = vector.load %arg15[%c0_75, %c0_76, %c0_77] : memref<1x64x32xf32, #tpu.memory_space<vmem>>, vector<1x64x32xf32>
    %163 = vector.shape_cast %162 : vector<1x64x32xf32> to vector<64x32xf32>
    %cst_78 = arith.constant dense<0.000000e+00> : vector<16x32xf32>
    %164 = tpu.matmul %161, %163, %cst_78 {dimension_numbers = #tpu.dot_dimension_numbers<[1], [0], [0], [1], [0, 0, 1, 1], [], []>} : vector<16x64xf32>, vector<64x32xf32>, vector<16x32xf32> -> vector<16x32xf32>
    %c0_79 = arith.constant 0 : index
    %c0_80 = arith.constant 0 : index
    %c0_81 = arith.constant 0 : index
    %165 = vector.load %arg16[%c0_79, %c0_80, %c0_81] : memref<1x1x32xf32, #tpu.memory_space<vmem>>, vector<1x1x32xf32>
    %166 = vector.shape_cast %165 : vector<1x1x32xf32> to vector<1x32xf32>
    %167 = vector.broadcast %166 : vector<1x32xf32> to vector<16x32xf32>
    %168 = arith.addf %164, %167 : vector<16x32xf32>
    %169 = arith.addf %152, %168 : vector<16x32xf32>
    %cst_82 = arith.constant dense<0.000000e+00> : vector<16xf32>
    %170 = vector.multi_reduction <add>, %169, %cst_82 [1] : vector<16x32xf32> to vector<16xf32>
    %171 = vector.shape_cast %170 : vector<16xf32> to vector<16x1xf32>
    %cst_83 = arith.constant 3.200000e+01 : f32
    %172 = vector.broadcast %cst_83 : f32 to vector<16x1xf32>
    %173 = arith.divf %171, %172 : vector<16x1xf32>
    %174 = vector.broadcast %173 : vector<16x1xf32> to vector<16x32xf32>
    %175 = arith.subf %169, %174 : vector<16x32xf32>
    %176 = vector.broadcast %173 : vector<16x1xf32> to vector<16x32xf32>
    %177 = arith.subf %169, %176 : vector<16x32xf32>
    %178 = arith.mulf %175, %177 : vector<16x32xf32>
    %cst_84 = arith.constant dense<0.000000e+00> : vector<16xf32>
    %179 = vector.multi_reduction <add>, %178, %cst_84 [1] : vector<16x32xf32> to vector<16xf32>
    %180 = vector.shape_cast %179 : vector<16xf32> to vector<16x1xf32>
    %cst_85 = arith.constant 3.200000e+01 : f32
    %181 = vector.broadcast %cst_85 : f32 to vector<16x1xf32>
    %182 = arith.divf %180, %181 : vector<16x1xf32>
    %183 = vector.broadcast %173 : vector<16x1xf32> to vector<16x32xf32>
    %184 = arith.subf %169, %183 : vector<16x32xf32>
    %cst_86 = arith.constant 9.99999974E-6 : f32
    %185 = vector.broadcast %cst_86 : f32 to vector<16x1xf32>
    %186 = arith.addf %182, %185 : vector<16x1xf32>
    %187 = math.rsqrt %186 : vector<16x1xf32>
    %188 = vector.broadcast %187 : vector<16x1xf32> to vector<16x32xf32>
    %189 = arith.mulf %184, %188 : vector<16x32xf32>
    %c0_87 = arith.constant 0 : index
    %c0_88 = arith.constant 0 : index
    %c0_89 = arith.constant 0 : index
    %190 = vector.load %arg17[%c0_87, %c0_88, %c0_89] : memref<1x1x32xf32, #tpu.memory_space<vmem>>, vector<1x1x32xf32>
    %191 = vector.shape_cast %190 : vector<1x1x32xf32> to vector<1x32xf32>
    %192 = vector.broadcast %191 : vector<1x32xf32> to vector<16x32xf32>
    %193 = arith.mulf %189, %192 : vector<16x32xf32>
    %c0_90 = arith.constant 0 : index
    %c0_91 = arith.constant 0 : index
    %c0_92 = arith.constant 0 : index
    %194 = vector.load %arg18[%c0_90, %c0_91, %c0_92] : memref<1x1x32xf32, #tpu.memory_space<vmem>>, vector<1x1x32xf32>
    %195 = vector.shape_cast %194 : vector<1x1x32xf32> to vector<1x32xf32>
    %196 = vector.broadcast %195 : vector<1x32xf32> to vector<16x32xf32>
    %197 = arith.addf %193, %196 : vector<16x32xf32>
    %c0_93 = arith.constant 0 : index
    %c0_94 = arith.constant 0 : index
    %198 = vector.load %arg20[%c0_93, %c0_94] : memref<16x32xf32, #tpu.memory_space<vmem>>, vector<16x32xf32>
    tpu.vector_store %arg20[%c0_93, %c0_94], %197 {strides = array<i32>} : memref<16x32xf32, #tpu.memory_space<vmem>>, vector<16x32xf32>,
    %c1_i32 = arith.constant 1 : i32
    %199 = arith.cmpi eq, %arg0, %c1_i32 : i32
    %200 = arith.extui %199 : i1 to i32
    %c0_i32_95 = arith.constant 0 : i32
    %201 = arith.cmpi ne, %200, %c0_i32_95 : i32
    scf.if %201 {
      %c0_96 = arith.constant 0 : index
      %c0_97 = arith.constant 0 : index
      %202 = vector.load %arg19[%c0_96, %c0_97] : memref<16x32xf32, #tpu.memory_space<vmem>>, vector<16x32xf32>
      tpu.vector_store %arg19[%c0_96, %c0_97], %197 {strides = array<i32>} : memref<16x32xf32, #tpu.memory_space<vmem>>, vector<16x32xf32>,
    } else {
    }
    return
  }
  func.func @transform_0(%arg0: i32) -> (i32, i32) {
    %c0_i32 = arith.constant 0 : i32
    %c0_i32_0 = arith.constant 0 : i32
    %c0_i32_1 = arith.constant 0 : i32
    return %c0_i32, %c0_i32_0 : i32, i32
  }
  func.func @transform_1(%arg0: i32) -> (i32, i32, i32) {
    %c0_i32 = arith.constant 0 : i32
    %c0_i32_0 = arith.constant 0 : i32
    %c0_i32_1 = arith.constant 0 : i32
    %c0_i32_2 = arith.constant 0 : i32
    return %c0_i32, %c0_i32_0, %c0_i32_1 : i32, i32, i32
  }
  func.func @transform_2(%arg0: i32) -> (i32, i32, i32) {
    %c0_i32 = arith.constant 0 : i32
    %c0_i32_0 = arith.constant 0 : i32
    %c0_i32_1 = arith.constant 0 : i32
    return %arg0, %c0_i32, %c0_i32_0 : i32, i32, i32
  }
  func.func @transform_3(%arg0: i32) -> (i32, i32, i32) {
    %c0_i32 = arith.constant 0 : i32
    %c0_i32_0 = arith.constant 0 : i32
    %c0_i32_1 = arith.constant 0 : i32
    return %arg0, %c0_i32, %c0_i32_0 : i32, i32, i32
  }
  func.func @transform_4(%arg0: i32) -> (i32, i32, i32) {
    %c0_i32 = arith.constant 0 : i32
    %c0_i32_0 = arith.constant 0 : i32
    %c0_i32_1 = arith.constant 0 : i32
    return %arg0, %c0_i32, %c0_i32_0 : i32, i32, i32
  }
  func.func @transform_5(%arg0: i32) -> (i32, i32, i32) {
    %c0_i32 = arith.constant 0 : i32
    %c0_i32_0 = arith.constant 0 : i32
    %c0_i32_1 = arith.constant 0 : i32
    return %arg0, %c0_i32, %c0_i32_0 : i32, i32, i32
  }
  func.func @transform_6(%arg0: i32) -> (i32, i32, i32) {
    %c0_i32 = arith.constant 0 : i32
    %c0_i32_0 = arith.constant 0 : i32
    %c0_i32_1 = arith.constant 0 : i32
    return %arg0, %c0_i32, %c0_i32_0 : i32, i32, i32
  }
  func.func @transform_7(%arg0: i32) -> (i32, i32, i32) {
    %c0_i32 = arith.constant 0 : i32
    %c0_i32_0 = arith.constant 0 : i32
    %c0_i32_1 = arith.constant 0 : i32
    return %arg0, %c0_i32, %c0_i32_0 : i32, i32, i32
  }
  func.func @transform_8(%arg0: i32) -> (i32, i32, i32) {
    %c0_i32 = arith.constant 0 : i32
    %c0_i32_0 = arith.constant 0 : i32
    %c0_i32_1 = arith.constant 0 : i32
    return %arg0, %c0_i32, %c0_i32_0 : i32, i32, i32
  }
  func.func @transform_9(%arg0: i32) -> (i32, i32, i32) {
    %c0_i32 = arith.constant 0 : i32
    %c0_i32_0 = arith.constant 0 : i32
    %c0_i32_1 = arith.constant 0 : i32
    return %arg0, %c0_i32, %c0_i32_0 : i32, i32, i32
  }
  func.func @transform_10(%arg0: i32) -> (i32, i32, i32) {
    %c0_i32 = arith.constant 0 : i32
    %c0_i32_0 = arith.constant 0 : i32
    %c0_i32_1 = arith.constant 0 : i32
    return %arg0, %c0_i32, %c0_i32_0 : i32, i32, i32
  }
  func.func @transform_11(%arg0: i32) -> (i32, i32, i32) {
    %c0_i32 = arith.constant 0 : i32
    %c0_i32_0 = arith.constant 0 : i32
    %c0_i32_1 = arith.constant 0 : i32
    return %arg0, %c0_i32, %c0_i32_0 : i32, i32, i32
  }
  func.func @transform_12(%arg0: i32) -> (i32, i32, i32) {
    %c0_i32 = arith.constant 0 : i32
    %c0_i32_0 = arith.constant 0 : i32
    %c0_i32_1 = arith.constant 0 : i32
    return %arg0, %c0_i32, %c0_i32_0 : i32, i32, i32
  }
  func.func @transform_13(%arg0: i32) -> (i32, i32, i32) {
    %c0_i32 = arith.constant 0 : i32
    %c0_i32_0 = arith.constant 0 : i32
    %c0_i32_1 = arith.constant 0 : i32
    return %arg0, %c0_i32, %c0_i32_0 : i32, i32, i32
  }
  func.func @transform_14(%arg0: i32) -> (i32, i32, i32) {
    %c0_i32 = arith.constant 0 : i32
    %c0_i32_0 = arith.constant 0 : i32
    %c0_i32_1 = arith.constant 0 : i32
    return %arg0, %c0_i32, %c0_i32_0 : i32, i32, i32
  }
  func.func @transform_15(%arg0: i32) -> (i32, i32, i32) {
    %c0_i32 = arith.constant 0 : i32
    %c0_i32_0 = arith.constant 0 : i32
    %c0_i32_1 = arith.constant 0 : i32
    return %arg0, %c0_i32, %c0_i32_0 : i32, i32, i32
  }
  func.func @transform_16(%arg0: i32) -> (i32, i32, i32) {
    %c0_i32 = arith.constant 0 : i32
    %c0_i32_0 = arith.constant 0 : i32
    %c0_i32_1 = arith.constant 0 : i32
    return %arg0, %c0_i32, %c0_i32_0 : i32, i32, i32
  }
  func.func @transform_17(%arg0: i32) -> (i32, i32, i32) {
    %c0_i32 = arith.constant 0 : i32
    %c0_i32_0 = arith.constant 0 : i32
    %c0_i32_1 = arith.constant 0 : i32
    return %arg0, %c0_i32, %c0_i32_0 : i32, i32, i32
  }
  func.func @transform_18(%arg0: i32) -> (i32, i32) {
    %c0_i32 = arith.constant 0 : i32
    %c0_i32_0 = arith.constant 0 : i32
    %c0_i32_1 = arith.constant 0 : i32
    return %c0_i32, %c0_i32_0 : i32, i32
  }
}

</mosaic_0001>

<bundles_post_ra>
// kernel: tpu_custom_call.1
= control target key start
LH: loop header
LB: loop body
LE: loop exit
PB: predicated region body
PF: predicated region fallthrough
CT: control target
= control target key end

     0   :  { %s3425_s0 = inlined_call_operand.hbm [shape: f32[16,32], index: 0, kind: input, shape index: {}]   ;;  %s3426_s1 = inlined_call_operand.hbm [shape: f32[2,1,8], index: 1, kind: input, shape index: {}]   ;;  %s3427_s2 = inlined_call_operand.vmem [shape: f32[2,32,32], index: 2, kind: input, shape index: {}]   ;;  %s3428_s3 = inlined_call_operand.vmem [shape: f32[2,1,32], index: 3, kind: input, shape index: {}]   ;;  %s3429_s4 = inlined_call_operand.vmem [shape: f32[2,32,32], index: 4, kind: input, shape index: {}]   ;;  %s3430_s5 = inlined_call_operand.hbm [shape: f32[2,1,32], index: 5, kind: input, shape index: {}]   ;;  %s3431_s6 = inlined_call_operand.vmem [shape: f32[2,32,32], index: 6, kind: input, shape index: {}]   ;;  %s3432_s7 = inlined_call_operand.vmem [shape: f32[2,1,32], index: 7, kind: input, shape index: {}]   ;;  %s3433_s8 = inlined_call_operand.hbm [shape: f32[2,32,32], index: 8, kind: input, shape index: {}]   ;;  %s3434_s9 = inlined_call_operand.vmem [shape: f32[2,1,32], index: 9, kind: input, shape index: {}]   ;;  %s3435_s10 = inlined_call_operand.vmem [shape: f32[2,1,32], index: 10, kind: input, shape index: {}]   ;;  %s3436_s11 = inlined_call_operand.hbm [shape: f32[2,1,32], index: 11, kind: input, shape index: {}]   ;;  %s3437_s12 = inlined_call_operand.hbm [shape: f32[2,32,64], index: 12, kind: input, shape index: {}]   ;;  %s3438_s13 = inlined_call_operand.vmem [shape: f32[2,1,64], index: 13, kind: input, shape index: {}]   ;;  %s3439_s14 = inlined_call_operand.vmem [shape: f32[2,64,32], index: 14, kind: input, shape index: {}]   ;;  %s3440_s15 = inlined_call_operand.vmem [shape: f32[2,1,32], index: 15, kind: input, shape index: {}]   ;;  %s3441_s16 = inlined_call_operand.vmem [shape: f32[2,1,32], index: 16, kind: input, shape index: {}]   ;;  %s3442_s17 = inlined_call_operand.hbm [shape: f32[2,1,32], index: 17, kind: input, shape index: {}]   ;;  %s3443_s18 = inlined_call_operand.hbm [shape: f32[16,32], index: 18, kind: output, shape index: {}]  }
   0x1   :  { %3452 = sst [smem:[#allocation21_spill]] %s3425_s0 }
   0x2   :  { %3453 = sst [smem:[#allocation22_spill]] %s3426_s1 }
   0x3   :  { %3454 = sst [smem:[#allocation23_spill]] %s3427_s2 }
   0x4   :  { %3455 = sst [smem:[#allocation24_spill]] %s3429_s4 }
   0x5   :  { %3456 = sst [smem:[#allocation25_spill]] %s3430_s5 }
   0x6   :  { %3457 = sst [smem:[#allocation26_spill]] %s3431_s6 }
   0x7   :  { %3458 = sst [smem:[#allocation27_spill]] %s3432_s7 }
   0x8   :  { %3459 = sst [smem:[#allocation28_spill]] %s3433_s8 }
   0x9   :  { %3460 = sst [smem:[#allocation29_spill]] %s3434_s9 }
   0xa   :  { %3461 = sst [smem:[#allocation30_spill]] %s3435_s10 }
   0xb   :  { %3462 = sst [smem:[#allocation31_spill]] %s3436_s11 }
   0xc   :  { %3463 = sst [smem:[#allocation32_spill]] %s3437_s12 }
   0xd   :  { %3464 = sst [smem:[#allocation33_spill]] %s3438_s13 }
   0xe   :  { %3465 = sst [smem:[#allocation34_spill]] %s3439_s14 }
   0xf   :  { %3466 = sst [smem:[#allocation35_spill]] %s3440_s15 }
  0x10   :  { %3467 = sst [smem:[#allocation36_spill]] %s3441_s16 }
  0x11   :  { %3468 = sst [smem:[#allocation37_spill]] %s3443_s18 }
  0x12   :  { %23 = vsyncpa [#allocation4], 0 }
  0x13   :  { %24 = vsyncpa [#allocation7], 0 }
  0x14   :  { %25 = vsyncpa [#allocation5], 0  ;;  %s2913_s27 = smov 0   ;;  %s2915_s28 = smov 0  }
  0x15   :  { %s2917_s29 = smov 0   ;;  %s2919_s30 = smov 0  }
  0x16 LB: > { %3469 = sst [smem:[#allocation18_spill]] %s2799_s29  ;;  %s2932_s0 = sadd.s32 4294967295, %s2803_s30   ;;  %s2803_s30 = sphi %s2919_s30, %s3509_s30   ;;  %s2799_s29 = sphi %s2917_s29, %s3511_s29   ;;  %s2795_s28 = sphi %s2915_s28, %s3513_s28   ;;  %s2791_s27 = sphi %s2913_s27, %s3512_s27  }
  0x17   : > { %p171_p0 = scmp.ne.s32.totalorder %s2795_s28, %s2791_s27  ;;  %p172_p1 = scmp.eq.s32.totalorder %s2932_s0, 0 }
  0x18   : > { %p2282_p2 = scmp.ge.s32.totalorder %s2803_s30, 1  ;;  %p515_p3 = scmp.lt.s32.totalorder %s2803_s30, 3 }
  0x19   : > { %p2283_p4 = scmp.ne.s32.totalorder %s2932_s0, 0  ;;  %p2941_p5 = por %p172_p1, %p171_p0 }
  0x1a   : > { %s3471_s21 = sld [smem:[#allocation21_spill]]  ;;  %p2948_p6 = pnand %p2282_p2, %p515_p3 }
  0x1b   : > { %s2805_s23 = smov [#allocation3]   ;;  %s2961_s26 = sadd.s32 1, %s2803_s30  }
  0x1c   : > { %p2385_p7 = pneg %p2948_p6  ;;  %s528_s24 = sshll.u32 %s2805_s23, 4  ;;  %s529_s24 = int_to_ptr.vmem [resolvable:$true] %s528_s24 }
  0x1d   : > { %3474 = sst [smem:[#allocation19_spill]] %s2961_s26  ;;  %s3444_s27 = smov 128  }
  0x1e   : > { %p2956_p8 = pnand %p2385_p7, %p172_p1  ;;  %s3446_s1 = smov 8  }
  0x1f   : > { %s155_s20 = ssub.s32 %s2803_s30, %s2961_s26  ;;  %p165_p10 = scmp.ne.s32.totalorder %s2799_s29, %s2795_s28 }
  0x20   : > { %s526_s22 = sshll.u32 %s3471_s21, 4  ;;  %s158_s21 = sadd.s32 1, %s2799_s29  ;;  %s527_s22 = int_to_ptr.hbm [resolvable:$true] %s526_s22 }
  0x21   : > { %2388 = dma.hbm_to_vmem [thread:$0]  (!%p2956_p8), %s527_s22, 256, %s529_s24, [#allocation4], %s3444_s27, %s3444_s27, %s3446_s1  }
  0x22   : > { %p156_p9 = scmp.eq.s32.totalorder %s155_s20, 0  ;;  %p166_p11 = scmp.eq.s32.totalorder %s2803_s30, 0 }
  0x23   : > { %p2410_p12 = scmp.lt.s32.totalorder %s2803_s30, 2  ;;  %s578_s18 = sand.u32 1, %s2803_s30  }
  0x24   : > { %s2976_s23 = scalar_select %p156_p9, %s2799_s29, %s158_s21  }
  0x25   : > { %p167_p13 = por %p166_p11, %p165_p10  ;;  %s2980_s16 = sand.u32 1, %s2799_s29  }
  0x26   : > { %3475 = sst [smem:[#allocation20_spill]] %s2976_s23  ;;  %s581_s27 = scalar_lea.vmem [#allocation8], %s2980_s16 }
  0x27   : > { %s3476_s5 = sld [smem:[#allocation25_spill]]  ;;  %s588_s20 = sshll.u32 %s581_s27, 4  ;;  %s589_s20 = int_to_ptr.vmem [resolvable:$true] %s588_s20 }
  0x28   : > { %p2987_p0 = pnand %p2410_p12, %p167_p13  ;;  %s3451_s23 = sshll.u32 %s2803_s30, 5 }
  0x29   : > { %s3478_s8 = sld [smem:[#allocation28_spill]]  ;;  %s2998_s15 = scalar_lea.sflag [#allocation4], %s578_s18 }
  0x2a   : > { %p3002_p3 = pneg %p2987_p0 }
  0x2d   : > { %s584_s22 = scalar_lea.hbm %s3476_s5, %s2803_s30  ;;  %s2556_s29 = scalar_lea.hbm %s3476_s5, 2 }
  0x2e   : > { %s586_s24 = sshll.u32 %s584_s22, 4  ;;  %s587_s24 = int_to_ptr.hbm [resolvable:$true] %s586_s24 }
  0x2f   : > { %s618_s14 = scalar_lea.hbm %s3478_s8, %s3451_s23  ;;  %s2549_s13 = sshra.s32 %s587_s24, 4  ;;  %s2550_s13 = int_to_ptr.hbm [resolvable:$true] %s2549_s13 }
  0x30   : > { %s2551_s22 = scalar_lea.hbm %s2550_s13, 1  ;;  %p2557_p10 = scmp.lt.s32.totalorder %s2550_s13, %s3476_s5 }
  0x31   : > { %p2552_p2 = scmp.ne.s32.totalorder %s2550_s13, %s2551_s22  ;;  %p2558_p11 = scmp.lt.s32.totalorder %s2556_s29, %s2551_s22 }
  0x33   : > { %p2554_p7 = pnand %p3002_p3, %p2552_p2  ;;  %p2559_p12 = por %p2558_p11, %p2557_p10 }
  0x35   : > { %p2555_p9 = pneg %p2554_p7 }
  0x37   : > { %p2560_p13 = pnand %p2559_p12, %p2555_p9 }
  0x39   : > { %2563 = shalt.err (!%p2560_p13)
}
  0x3a   : > { %2395 = dma.hbm_to_vmem [thread:$0]  (!%p2987_p0), %s587_s24, 16, %s589_s20, %s2998_s15  }
  0x3b   : > { %s619_s23 = sshll.u32 %s618_s14, 4  ;;  %s3480_s9 = sshll.u32 %s2980_s16, 5  ;;  %s620_s23 = int_to_ptr.hbm [resolvable:$true] %s619_s23 }
  0x3c   : > { %s613_s7 = scalar_lea.vmem [#allocation9], %s3480_s9  ;;  %s2579_s10 = sshra.s32 %s620_s23, 4  ;;  %s2580_s10 = int_to_ptr.hbm [resolvable:$true] %s2579_s10 }
  0x3d   : > { %s621_s6 = sshll.u32 %s613_s7, 4  ;;  %s2581_s21 = scalar_lea.hbm %s2580_s10, 32  ;;  %s622_s6 = int_to_ptr.vmem [resolvable:$true] %s621_s6 }
  0x3e   : > { %p2582_p2 = scmp.ne.s32.totalorder %s2580_s10, %s2581_s21  ;;  %s2586_s29 = scalar_lea.hbm %s3478_s8, 64 }
  0x3f   : > { %p2587_p10 = scmp.lt.s32.totalorder %s2580_s10, %s3478_s8  ;;  %p2588_p11 = scmp.lt.s32.totalorder %s2586_s29, %s2581_s21 }
  0x40   : > { %p2584_p7 = pnand %p2582_p2, %p3002_p3 }
  0x41   : > { %p2589_p12 = por %p2588_p11, %p2587_p10 }
  0x42   : > { %p2585_p9 = pneg %p2584_p7 }
  0x44   : > { %p2590_p13 = pnand %p2589_p12, %p2585_p9 }
  0x46   : > { %2593 = shalt.err (!%p2590_p13)
}
  0x47   : > { %s3481_s7 = smov 8   ;;  %s3482_s9 = smov 128  }
  0x48   : > { %2398 = dma.hbm_to_vmem [thread:$0]  (!%p2987_p0), %s620_s23, 512, %s622_s6, %s2998_s15, %s3482_s9, %s3482_s9, %s3481_s7  }
  0x49   : > { %s3483_s11 = sld [smem:[#allocation31_spill]]  ;;  %s646_s10 = scalar_lea.vmem [#allocation10], %s2980_s16 }
  0x4a   : > { %s653_s21 = sshll.u32 %s646_s10, 4  ;;  %s654_s21 = int_to_ptr.vmem [resolvable:$true] %s653_s21 }
  0x4f   : > { %s649_s14 = scalar_lea.hbm %s3483_s11, %s2803_s30  ;;  %s2616_s6 = scalar_lea.hbm %s3483_s11, 2 }
  0x50   : > { %s651_s13 = sshll.u32 %s649_s14, 4  ;;  %s652_s13 = int_to_ptr.hbm [resolvable:$true] %s651_s13 }
  0x51   : > { %s2609_s22 = sshra.s32 %s652_s13, 4  ;;  %s2610_s22 = int_to_ptr.hbm [resolvable:$true] %s2609_s22 }
  0x52   : > { %s2611_s29 = scalar_lea.hbm %s2610_s22, 1  ;;  %p2617_p10 = scmp.lt.s32.totalorder %s2610_s22, %s3483_s11 }
  0x53   : > { %p2612_p2 = scmp.ne.s32.totalorder %s2610_s22, %s2611_s29  ;;  %p2618_p11 = scmp.lt.s32.totalorder %s2616_s6, %s2611_s29 }
  0x55   : > { %p2614_p7 = pnand %p2612_p2, %p3002_p3  ;;  %p2619_p12 = por %p2618_p11, %p2617_p10 }
  0x57   : > { %p2615_p9 = pneg %p2614_p7 }
  0x59   : > { %p2620_p13 = pnand %p2619_p12, %p2615_p9 }
  0x5b   : > { %2623 = shalt.err (!%p2620_p13)
}
  0x5c   : > { %2401 = dma.hbm_to_vmem [thread:$0]  (!%p2987_p0), %s652_s13, 16, %s654_s21, %s2998_s15  }
  0x5d   : > { %s3484_s24 = sshll.u32 %s2803_s30, 5  ;;  %s3485_s12 = sld [smem:[#allocation32_spill]] }
  0x5e   : > { %s3486_s18 = sshll.u32 %s2980_s16, 5 }
  0x5f   : > { %s664_s5 = scalar_lea.vmem [#allocation11], %s3486_s18 }
  0x60   : > { %s672_s22 = sshll.u32 %s664_s5, 4  ;;  %s673_s22 = int_to_ptr.vmem [resolvable:$true] %s672_s22 }
  0x63   : > { %s669_s10 = scalar_lea.hbm %s3485_s12, %s3484_s24  ;;  %s2646_s21 = scalar_lea.hbm %s3485_s12, 64 }
  0x64   : > { %s670_s26 = sshll.u32 %s669_s10, 4  ;;  %s671_s26 = int_to_ptr.hbm [resolvable:$true] %s670_s26 }
  0x65   : > { %s2639_s29 = sshra.s32 %s671_s26, 4  ;;  %s2640_s29 = int_to_ptr.hbm [resolvable:$true] %s2639_s29 }
  0x66   : > { %s2641_s6 = scalar_lea.hbm %s2640_s29, 32  ;;  %p2647_p10 = scmp.lt.s32.totalorder %s2640_s29, %s3485_s12 }
  0x67   : > { %p2642_p2 = scmp.ne.s32.totalorder %s2640_s29, %s2641_s6  ;;  %p2648_p11 = scmp.lt.s32.totalorder %s2646_s21, %s2641_s6 }
  0x69   : > { %p2644_p7 = pnand %p2642_p2, %p3002_p3  ;;  %p2649_p12 = por %p2648_p11, %p2647_p10 }
  0x6b   : > { %p2645_p9 = pneg %p2644_p7 }
  0x6d   : > { %p2650_p13 = pnand %p2649_p12, %p2645_p9 }
  0x6f   : > { %2653 = shalt.err (!%p2650_p13)
}
  0x70   : > { %2404 = dma.hbm_to_vmem [thread:$0]  (!%p2987_p0), %s671_s26, 512, %s673_s22, %s2998_s15, %s3482_s9, %s3482_s9, %s3481_s7  }
  0x71   : > { %s3487_s10 = sld [smem:[#allocation22_spill]]  ;;  %s2808_s8 = smov [#allocation6]  }
  0x72   : > { %s542_s5 = sshll.u32 %s2808_s8, 4  ;;  %s2809_s29 = smov 16   ;;  %s543_s5 = int_to_ptr.vmem [resolvable:$true] %s542_s5 }
  0x73   : > { %s2810_s6 = smov 1   ;;  %s714_s21 = scalar_lea.hbm %s3442_s17, %s2803_s30 }
  0x74   : > { %s711_s20 = scalar_lea.vmem [#allocation12], %s2980_s16  ;;  %s716_s7 = sshll.u32 %s714_s21, 4  ;;  %s717_s7 = int_to_ptr.hbm [resolvable:$true] %s716_s7 }
  0x75   : > { %s718_s11 = sshll.u32 %s711_s20, 4  ;;  %s2699_s9 = sshra.s32 %s717_s7, 4  ;;  %s719_s11 = int_to_ptr.vmem [resolvable:$true] %s718_s11  ;;  %s2700_s9 = int_to_ptr.hbm [resolvable:$true] %s2699_s9 }
  0x76   : > { %s2701_s26 = scalar_lea.hbm %s2700_s9, 1  ;;  %s2706_s25 = scalar_lea.hbm %s3442_s17, 2 }
  0x77   : > { %s540_s18 = sshll.u32 %s3487_s10, 4  ;;  %p2702_p2 = scmp.ne.s32.totalorder %s2700_s9, %s2701_s26  ;;  %s541_s18 = int_to_ptr.hbm [resolvable:$true] %s540_s18 }
  0x78   : > { %2391 = dma.hbm_to_vmem [thread:$0]  (!%p2956_p8), %s541_s18, 32, %s543_s5, [#allocation7], %s2809_s29, %s2809_s29, %s2810_s6  }
  0x79   : > { %p2704_p7 = pnand %p2702_p2, %p3002_p3  ;;  %p2707_p8 = scmp.lt.s32.totalorder %s2700_s9, %s3442_s17 }
  0x7a   : > { %p2708_p10 = scmp.lt.s32.totalorder %s2706_s25, %s2701_s26 }
  0x7b   : > { %p2705_p9 = pneg %p2704_p7 }
  0x7c   : > { %p2709_p11 = por %p2708_p10, %p2707_p8 }
  0x7e   : > { %p2710_p12 = pnand %p2709_p11, %p2705_p9 }
  0x80   : > { %2713 = shalt.err (!%p2710_p12)
}
  0x81   : > { %2407 = dma.hbm_to_vmem [thread:$0]  (!%p2987_p0), %s717_s7, 16, %s719_s11, %s2998_s15  }
  0x82   : > { %727 = sbr.rel (%p2948_p6) target bundleno = 2710 (0xa96), region = 92 }
  0x87   : > { %2774 = dma.done.wait (%p172_p1), [#allocation4], 256  }
  0x88   : > { %2776 = vsyncadd (%p172_p1), [#allocation4], 4294967040 }
  0x89   : > { %2778 = dma.done.wait (%p172_p1), [#allocation7], 32  }
  0x8a   : > { %2780 = vsyncadd (%p172_p1), [#allocation7], 4294967264  ;;  %s739_s16 = sand.u32 1, %s2932_s0   ;;  %s3103_s11 = sand.u32 1, %s2795_s28  }
  0x8b   : > { %s740_s30 = scalar_lea.sflag [#allocation4], %s739_s16 }
  0x8c   : > { %2782 = dma.done.wait (%p2941_p5), %s740_s30, 1072  }
  0x8d   : > { %2784 = vsyncadd (%p2941_p5), %s740_s30, 4294966224  ;;  %s2295_s1 = sshll.u32 %s3103_s11, 5  ;;  %p887_p6 = scmp.lt.s32.totalorder %s2932_s0, 1 }
  0x8e   : > { %s3488_s6 = sld [smem:[#allocation23_spill]]  ;;  %s3165_s5 = scalar_lea.vmem [#allocation9], %s2295_s1 }
  0x8f   : > { %s3113_s15 = scalar_select %p887_p6, %s2932_s0, 1 }
  0x90   : > { %s3489_s4 = sld [smem:[#allocation24_spill]]  ;;  %s761_s29 = scalar_lea.vmem [#allocation10], %s3103_s11 }
  0x91   : > { %s2355_s27 = sshll.u32 %s3113_s15, 5  ;;  %s3490_s26 = sld [smem:[#allocation26_spill]] }
  0x92   : > { %s3494_s2 = sld [smem:[#allocation33_spill]]  ;;  %s2358_s12 = sshll.u32 %s3113_s15, 6 }
  0x93   : > { %s3495_s9 = sld [smem:[#allocation34_spill]] }
  0x94   : > { %s3123_s23 = scalar_lea.vmem %s3488_s6, %s2355_s27  ;;  %s3493_s6 = sld [smem:[#allocation30_spill]] }
  0x95   : > { %s3496_s14 = sld [smem:[#allocation35_spill]] }
  0x96   : > { %s3128_s20 = scalar_lea.vmem %s3489_s4, %s2355_s27  ;;  %s3497_s19 = sld [smem:[#allocation36_spill]] }
  0x97   : > { %s3133_s22 = scalar_lea.vmem %s3490_s26, %s2355_s27 }
  0x98   : > { %s916_s4 = scalar_lea.vmem %s3494_s2, %s3113_s15  ;;  %s780_s2 = scalar_lea.vmem [#allocation12], %s3103_s11 }
  0x99   : > { %s3155_s26 = scalar_lea.vmem %s3495_s9, %s2358_s12  ;;  %931 = sbr.rel (%p2283_p4) target bundleno = 161 (0xa1), region = 124 }
  0x9a   : > { %s913_s8 = scalar_lea.vmem %s3493_s6, %s3113_s15  ;;  %s3168_s6 = scalar_lea.vmem [#allocation11], %s2295_s1 }
  0x9b   : > { %s924_s10 = scalar_lea.vmem %s3496_s14, %s3113_s15 }
  0x9c   : > { %s927_s18 = scalar_lea.vmem %s3497_s19, %s3113_s15 }
  0x9e   : > { %v932_v0 = vld [vmem:[#allocation3] sm:$0xff]  ;;  %vm934_vm0 = vcmask 261120   ;;  %v933_v1 = vld [vmem:[#allocation3 + $0x8] sm:$0xff] }
  0x9f   : > { %935 = vst.msk [vmem:[#allocation2] sm:$0xff] %vm934_vm0, %v932_v0 }
  0xa0   : > { %936 = vst.msk [vmem:[#allocation2 + $0x8] sm:$0xff] %vm934_vm0, %v933_v1 }
  0xa1 PF: > { %v982_v2 = vld [vmem:[%s3128_s20 + $0x18] sm:$0xff]  ;;  %v981_v4 = vld [vmem:[%s3128_s20 + $0x10] sm:$0xff]  ;;  %v980_v6 = vld [vmem:[%s3128_s20 + $0x8] sm:$0xff]  ;;  %vm949_vm1 = vcmask 261120   ;;  %s3498_s12 = scalar_lea.vmem [#allocation8], %s3103_s11  ;;  %vm1045_vm2 = vcmask 64512  }
  0xa2   : > { %v944_v3 = vld [vmem:[%s3123_s23 + $0x18] sm:$0xff]  ;;  %999 = vmatpush.msra.mxu1 %v982_v2  ;;  %v943_v5 = vld [vmem:[%s3123_s23 + $0x10] sm:$0xff]  ;;  %v942_v7 = vld [vmem:[%s3123_s23 + $0x8] sm:$0xff]  ;;  %s3500_s7 = sld [smem:[#allocation27_spill]]  ;;  %s2812_s9 = smov 112  }
  0xa3   : > { %2359 = vmatpush.msra.mxu2 %v944_v3  ;;  %968 = vmatpush.msra.mxu0 %v944_v3  ;;  %v979_v8 = vld [vmem:[%s3128_s20] sm:$0xff]  ;;  %v1013_v12 = vld [vmem:[%s3133_s22 + $0x18] sm:$0xff]  ;;  %v1012_v13 = vld [vmem:[%s3133_s22 + $0x10] sm:$0xff]  ;;  %s3499_s20 = scalar_lea.vmem %s3428_s3, %s3113_s15  ;;  %s2813_s24 = smov 104  }
  0xa4   : > { %1000 = vmatpush.msra.mxu1 %v981_v4  ;;  %v941_v10 = vld [vmem:[%s3123_s23] sm:$0xff]  ;;  %v1011_v14 = vld [vmem:[%s3133_s22 + $0x8] sm:$0xff]  ;;  %s3502_s16 = sld [smem:[#allocation29_spill]]  ;;  %p2348_p1 = scmp.ne.s32.totalorder %s2932_s0, 1 }
  0xa5   : > { %2360 = vmatpush.msra.mxu2 %v943_v5  ;;  %969 = vmatpush.msra.mxu0 %v943_v5  ;;  %v1010_v15 = vld [vmem:[%s3133_s22] sm:$0xff]  ;;  %s2811_s22 = smov 120  }
  0xa6   : > { %v3180_v9 = vld [vmem:[#allocation2] sm:$0xff]  ;;  %1001 = vmatpush.msra.mxu1 %v980_v6 }
  0xa7   : > { %2361 = vmatpush.msra.mxu2 %v942_v7  ;;  %v3183_v11 = vld [vmem:[#allocation2 + $0x8] sm:$0xff]  ;;  %970 = vmatpush.msra.mxu0 %v942_v7  ;;  %v2465_v16 = vld [vmem:[%s3498_s12] ss:$0 sm:$0xff]  ;;  %v3248_v39 = vld [vmem:[#allocation6 + $0x1] ss:$0 sm:$0xff] }
  0xa8   : > { %1002 = vmatpush.msra.mxu1 %v979_v8  ;;  %v2466_v17 = vld [vmem:[%s3499_s20] ss:$0 sm:$0xff]  ;;  %s3501_s27 = scalar_lea.vmem %s3500_s7, %s3113_s15 }
  0xa9   : > { %2362 = vmatpush.msra.mxu2 %v941_v10  ;;  %2308 = vmatmul.msk.f32.vlgmr.msra.gmra.mxu1 %vm949_vm1, %v3180_v9  ;;  %v2467_v24 = vld [vmem:[%s3501_s27] ss:$0 sm:$0xff] }
  0xaa   : > { %971 = vmatpush.msra.mxu0 %v941_v10  ;;  %2307 = vmatmul.msk.f32.vlgmr.msra.gmra.mxu2 %vm949_vm1, %v3183_v11  ;;  %v3244_v32 = vld [vmem:[#allocation6] ss:$0 sm:$0xff]  ;;  %s3503_s30 = scalar_lea.vmem %s3502_s16, %s3113_s15 }
  0xab   : > { %2306 = vmatmul.msk.f32.vlgmr.msra.gmra.mxu0 %vm949_vm1, %v3180_v9  ;;  %1030 = vmatpush.msrb.mxu2 %v1013_v12 }
  0xad   : > { %1031 = vmatpush.msrb.mxu2 %v1012_v13 }
  0xaf   : > { %1032 = vmatpush.msrb.mxu2 %v1011_v14 }
  0xb1   : > { %1033 = vmatpush.msrb.mxu2 %v1010_v15  ;;  %2309 = vmatmul.msk.f32.gmra.mxu1 %vm949_vm1, %v3183_v11 }
  0xb2   : > { %2310 = vmatmul.msk.f32.vlgmr.msrb.gmra.mxu2 %vm949_vm1, %v3180_v9 }
  0xba   : > { %2311 = vmatmul.msk.f32.gmra.mxu2 %vm949_vm1, %v3183_v11 }
 0x126   : > { %v1004_v18 = vpop.f32.mrf.mxu1 }
 0x127   : > { %v3208_v19 = vadd.f32 %v2465_v16, %v1004_v18 }
 0x128   : > { %v973_v20 = vpop.f32.mrf.mxu0 }
 0x129   : > { %v3210_v21 = vadd.f32 %v2466_v17, %v973_v20  ;;  %1204 = vrot.lane.b32.xlu0 %v3208_v19, %s2811_s22  ;;  %2312 = vmatpush.xpose.msk.msra.mxu3 %vm1045_vm2, %v3208_v19 }
 0x12c   : > { %2313 = vmatmul.msk.f32.vlgmr.msra.gmra.mxu3 %vm1045_vm2, %v3210_v21 }
 0x12d   : > { %v976_v22 = vpop.f32.mrf.mxu2 }
 0x12e   : > { %v3218_v23 = vadd.f32 %v2466_v17, %v976_v22  ;;  %v1007_v28 = vpop.f32.mrf.mxu1  ;;  %v1041_v17 = vld [vmem:[%s3165_s5] sm:$0xff] }
 0x12f   : > { %v3236_v29 = vadd.f32 %v2465_v16, %v1007_v28 }
 0x131   : > { %1202 = vrot.lane.b32.xlu0 %v3210_v21, %s2811_s22  ;;  %2314 = vmatpush.xpose.msk.msrb.mxu3 %vm1045_vm2, %v3236_v29 }
 0x134   : > { %2315 = vmatmul.msk.f32.vlgmr.msrb.gmra.mxu3 %vm1045_vm2, %v3218_v23 }
 0x135   : > { %v1035_v25 = vpop.f32.mrf.mxu2 }
 0x136   : > { %v3227_v26 = vadd.f32 %v2467_v24, %v1035_v25 }
 0x138   : > { %1174 = vmatpush.msra.mxu3 %v3227_v26 }
 0x139   : > { %1311 = vrot.lane.b32.xlu0 %v3227_v26, %s2811_s22 }
 0x13d   : > { %v1038_v51 = vpop.f32.mrf.mxu2 }
 0x13e   : > { %v3257_v52 = vadd.f32 %v2467_v24, %v1038_v51 }
 0x140   : > { %1197 = vmatpush.msrb.mxu0 %v3257_v52 }
 0x141   : > { %1424 = vrot.lane.b32.xlu0 %v3208_v19, %s2812_s9 }
 0x149   : > { %1422 = vrot.lane.b32.xlu0 %v3210_v21, %s2812_s9 }
 0x19b   : > { %v1205_v27 = vpop.permute.xlu0 %1204 }
 0x19c   : > { %2318 = vmatpush.xpose.msk.msrb.mxu1 %vm1045_vm2, %v1205_v27 }
 0x1a3   : > { %v1203_v30 = vpop.permute.xlu0 %1202 }
 0x1a4   : > { %2319 = vmatmul.msk.f32.vlgmr.msrb.gmra.mxu1 %vm1045_vm2, %v1203_v30 }
 0x1ab   : > { %v1312_v31 = vpop.permute.xlu0 %1311 }
 0x1ac   : > { %1332 = vmatpush.msrb.mxu3 %v1312_v31 }
 0x1af   : > { %v1069_v33 = vpop.f32.mrf.mxu3 }
 0x1b0   : > { %v1098_v34 = vmul.f32 0.35355338, %v1069_v33 }
 0x1b2   : > { %v1106_v35 = vadd.f32 %v3244_v32, %v1098_v34 }
 0x1b3   : > { %v1425_v7 = vpop.permute.xlu0 %1424 }
 0x1b4   : > { %v1108_v36 = vsel %vm1045_vm2, %v1106_v35, -inf }
 0x1b5   : > { %1109 = vmax.xlane.f32.xlu1 %v1108_v36 }
 0x1b7   : > { %v1095_v41 = vpop.f32.mrf.mxu3 }
 0x1b8   : > { %v1099_v42 = vmul.f32 0.35355338, %v1095_v41 }
 0x1ba   : > { %v1107_v44 = vadd.f32 %v3248_v39, %v1099_v42 }
 0x1bb   : > { %v1423_v8 = vpop.permute.xlu0 %1422 }
 0x1bc   : > { %v1111_v47 = vsel %vm1045_vm2, %v1107_v44, -inf }
 0x1bd   : > { %1112 = vmax.xlane.f32.xlu0 %v1111_v47 }
 0x221   : > { %v1227_v37 = vpop.f32.mrf.mxu1 }
 0x222   : > { %v1258_v38 = vmul.f32 0.35355338, %v1227_v37 }
 0x224   : > { %v1260_v40 = vadd.f32 %v3244_v32, %v1258_v38 }
 0x226   : > { %v1262_v43 = vsel %vm1045_vm2, %v1260_v40, -inf }
 0x227   : > { %1263 = vmax.xlane.f32.xlu1 %v1262_v43 }
 0x228   : > { %v1110_v45 = vpop.xlane.xlu1 %1109 }
 0x229   : > { %v1114_v46 = vsub.f32 %v1106_v35, %v1110_v45 }
 0x22b   : > { %v1116_v48 = vmul.f32 1.442695, %v1114_v46 }
 0x22d   : > { %2477 = vpow2.f32 %v1116_v48 }
 0x230   : > { %v1113_v10 = vpop.xlane.xlu0 %1112 }
 0x231   : > { %v1115_v12 = vsub.f32 %v1107_v44, %v1113_v10 }
 0x233   : > { %v2478_v49 = vpop.eup %2477  ;;  %v1118_v13 = vmul.f32 1.442695, %v1115_v12 }
 0x234   : > { %v1120_v50 = vsel %vm1045_vm2, %v2478_v49, 0.0 }
 0x235   : > { %1121 = vadd.xlane.f32.xlu2 %v1120_v50  ;;  %v1042_v50 = vld [vmem:[%s3165_s5 + $0x8] sm:$0xff] }
 0x236   : > { %1385 = vmatpush.msra.mxu1 %v1042_v50 }
 0x240   : > { %1232 = vrot.lane.b32.xlu1 %v3236_v29, %s2811_s22 }
 0x29a   : > { %v1264_v53 = vpop.xlane.xlu1 %1263 }
 0x29b   : > { %v1268_v54 = vsub.f32 %v1260_v40, %v1264_v53 }
 0x29d   : > { %v1270_v55 = vmul.f32 1.442695, %v1268_v54 }
 0x29f   : > { %2479 = vpow2.f32 %v1270_v55 }
 0x2a5   : > { %v2480_v56 = vpop.eup %2479 }
 0x2a6   : > { %v1274_v57 = vsel %vm1045_vm2, %v2480_v56, 0.0 }
 0x2a7   : > { %1275 = vadd.xlane.f32.xlu2 %v1274_v57 }
 0x2a8   : > { %v1122_v58 = vpop.xlane.xlu2 %1121 }
 0x2a9   : > { %2481 = vrcp.f32 %v1122_v58  ;;  %v1137_v63 = vand.u32 2147483648, %v1122_v58  ;;  %v1135_v1 = vand.u32 2147483647, %v1122_v58  ;;  %vm1131_vm4 = vweird.f32 %v1122_v58 }
 0x2aa   : > { %2483 = vpow2.f32 %v1118_v13 }
 0x2ab   : > { %v1138_v3 = vor.u32 1.1754944e-38, %v1137_v63  ;;  %vm1136_vm6 = vcmp.eq.f32.partialorder %v1135_v1, 8.507059e+37 }
 0x2af   : > { %v2482_v59 = vpop.eup %2481 }
 0x2b0   : > { %v1127_v60 = vmul.f32 %v2482_v59, %v1122_v58  ;;  %vm1132_vm3 = vweird.f32 %v2482_v59  ;;  %v2484_v14 = vpop.eup %2483 }
 0x2b1   : > { %vm1133_vm5 = vmor %vm1131_vm4, %vm1132_vm3  ;;  %v1123_v15 = vsel %vm1045_vm2, %v2484_v14, 0.0 }
 0x2b2   : > { %v1128_v61 = vsub.f32 1.0, %v1127_v60  ;;  %v1233_v62 = vpop.permute.xlu1 %1232 }
 0x2b3   : > { %2320 = vmatpush.xpose.msk.msra.mxu2 %vm1045_vm2, %v1233_v62 }
 0x2b4   : > { %v1129_v0 = vmul.f32 %v2482_v59, %v1128_v61 }
 0x2b6   : > { %v1130_v2 = vadd.f32 %v2482_v59, %v1129_v0 }
 0x2b7   : > { %1414 = vmatpush.msrb.mxu2 %v1041_v17 }
 0x2b8   : > { %v1134_v4 = vsel %vm1133_vm5, %v2482_v59, %v1130_v2 }
 0x2b9   : > { %v1139_v5 = vsel %vm1136_vm6, %v1138_v3, %v1134_v4 }
 0x2ba   : > { %v1140_v6 = vmul.f32 %v2478_v49, %v1139_v5 }
 0x2bc   : > { %2316 = vmatmul.msk.f32.vlgmr.msra.gmra.mxu3 %vm1045_vm2, %v1140_v6 }
 0x2bd   : > { %2328 = vmatpush.xpose.msk.msra.mxu3 %vm1045_vm2, %v1425_v7 }
 0x2bf   : > { %1230 = vrot.lane.b32.xlu2 %v3218_v23, %s2811_s22 }
 0x2e8   : > { %1124 = vadd.xlane.f32.xlu2 %v1123_v15 }
 0x31a   : > { %v1276_v16 = vpop.xlane.xlu2 %1275 }
 0x31b   : > { %2485 = vrcp.f32 %v1276_v16  ;;  %v1291_v25 = vand.u32 2147483648, %v1276_v16  ;;  %v1289_v28 = vand.u32 2147483647, %v1276_v16  ;;  %vm1285_vm8 = vweird.f32 %v1276_v16 }
 0x31d   : > { %v1292_v31 = vor.u32 1.1754944e-38, %v1291_v25  ;;  %vm1290_vm10 = vcmp.eq.f32.partialorder %v1289_v28, 8.507059e+37 }
 0x321   : > { %v2486_v18 = vpop.eup %2485 }
 0x322   : > { %v1281_v20 = vmul.f32 %v2486_v18, %v1276_v16  ;;  %v1231_v22 = vpop.permute.xlu2 %1230  ;;  %vm1286_vm7 = vweird.f32 %v2486_v18 }
 0x323   : > { %2321 = vmatmul.msk.f32.vlgmr.msra.gmra.mxu2 %vm1045_vm2, %v1231_v22  ;;  %vm1287_vm9 = vmor %vm1285_vm8, %vm1286_vm7 }
 0x324   : > { %v1282_v24 = vsub.f32 1.0, %v1281_v20 }
 0x326   : > { %v1283_v27 = vmul.f32 %v2486_v18, %v1282_v24 }
 0x328   : > { %v1284_v30 = vadd.f32 %v2486_v18, %v1283_v27 }
 0x32a   : > { %v1288_v33 = vsel %vm1287_vm9, %v2486_v18, %v1284_v30 }
 0x32b   : > { %v1293_v34 = vsel %vm1290_vm10, %v1292_v31, %v1288_v33 }
 0x32c   : > { %v1294_v35 = vmul.f32 %v2480_v56, %v1293_v34 }
 0x32e   : > { %2322 = vmatmul.msk.f32.vlgmr.msrb.gmra.mxu3 %vm1045_vm2, %v1294_v35 }
 0x336   : > { %2329 = vmatmul.msk.f32.vlgmr.msra.gmra.mxu3 %vm1045_vm2, %v1423_v8 }
 0x33f   : > { %v1176_v36 = vpop.f32.mrf.mxu3 }
 0x340   : > { %2326 = vmatmul.msk.f32.vlgmr.msrb.gmra.mxu2 %vm1045_vm2, %v1176_v36 }
 0x35b   : > { %v1125_v37 = vpop.xlane.xlu2 %1124 }
 0x35c   : > { %2487 = vrcp.f32 %v1125_v37  ;;  %v1152_v41 = vand.u32 2147483648, %v1125_v37  ;;  %vm1146_vm11 = vweird.f32 %v1125_v37  ;;  %v1150_v43 = vand.u32 2147483647, %v1125_v37 }
 0x35e   : > { %v1153_v45 = vor.u32 1.1754944e-38, %v1152_v41  ;;  %vm1151_vm14 = vcmp.eq.f32.partialorder %v1150_v43, 8.507059e+37 }
 0x362   : > { %v2488_v38 = vpop.eup %2487 }
 0x363   : > { %v1142_v40 = vmul.f32 %v2488_v38, %v1125_v37  ;;  %vm1147_vm12 = vweird.f32 %v2488_v38 }
 0x364   : > { %vm1148_vm13 = vmor %vm1146_vm11, %vm1147_vm12 }
 0x365   : > { %v1143_v42 = vsub.f32 1.0, %v1142_v40 }
 0x367   : > { %v1144_v44 = vmul.f32 %v2488_v38, %v1143_v42 }
 0x369   : > { %v1145_v46 = vadd.f32 %v2488_v38, %v1144_v44 }
 0x36b   : > { %v1149_v47 = vsel %vm1148_vm13, %v2488_v38, %v1145_v46 }
 0x36c   : > { %v1154_v48 = vsel %vm1151_vm14, %v1153_v45, %v1149_v47  ;;  %v1043_v45 = vld [vmem:[%s3165_s5 + $0x10] sm:$0xff] }
 0x36d   : > { %v1155_v49 = vmul.f32 %v2484_v14, %v1154_v48  ;;  %1603 = vmatpush.msrb.mxu1 %v1043_v45 }
 0x36f   : > { %2317 = vmatmul.msk.f32.vlgmr.msrb.gmra.mxu0 %vm1045_vm2, %v1155_v49 }
 0x3a6   : > { %v1255_v51 = vpop.f32.mrf.mxu2 }
 0x3a7   : > { %v1259_v53 = vmul.f32 0.35355338, %v1255_v51 }
 0x3a9   : > { %v1261_v54 = vadd.f32 %v3248_v39, %v1259_v53 }
 0x3ab   : > { %v1265_v55 = vsel %vm1045_vm2, %v1261_v54, -inf }
 0x3ac   : > { %1266 = vmax.xlane.f32.xlu1 %v1265_v55 }
 0x3b1   : > { %v1334_v56 = vpop.f32.mrf.mxu3 }
 0x3b2   : > { %2324 = vmatmul.msk.f32.vlgmr.msra.gmra.mxu1 %vm1045_vm2, %v1334_v56 }
 0x3b9   : > { %v1447_v57 = vpop.f32.mrf.mxu3 }
 0x3ba   : > { %v1478_v58 = vmul.f32 0.35355338, %v1447_v57 }
 0x3bc   : > { %v1480_v59 = vadd.f32 %v3244_v32, %v1478_v58 }
 0x3be   : > { %v1482_v60 = vsel %vm1045_vm2, %v1480_v59, -inf }
 0x3bf   : > { %1483 = vmax.xlane.f32.xlu2 %v1482_v60 }
 0x3c3   : > { %v3308_v47 = vpop.f32.mrf.mxu2 }
 0x3c5   : > { %1452 = vrot.lane.b32.xlu1 %v3236_v29, %s2812_s9 }
 0x3d7   : > { %1338 = vrot.lane.b32.xlu2 %v3257_v52, %s2811_s22 }
 0x3df   : > { %1450 = vrot.lane.b32.xlu2 %v3218_v23, %s2812_s9 }
 0x3e7   : > { %1641 = vrot.lane.b32.xlu2 %v3218_v23, %s2813_s24 }
 0x3ec   : > { %v1199_v61 = vpop.f32.mrf.mxu0 }
 0x3ed   : > { %2327 = vmatmul.msk.f32.gmra.mxu2 %vm1045_vm2, %v1199_v61 }
 0x41f   : > { %v1267_v62 = vpop.xlane.xlu1 %1266 }
 0x420   : > { %v1269_v63 = vsub.f32 %v1261_v54, %v1267_v62 }
 0x422   : > { %v1272_v0 = vmul.f32 1.442695, %v1269_v63 }
 0x424   : > { %2489 = vpow2.f32 %v1272_v0 }
 0x42a   : > { %v2490_v1 = vpop.eup %2489 }
 0x42b   : > { %v1277_v2 = vsel %vm1045_vm2, %v2490_v1, 0.0 }
 0x42c   : > { %1278 = vadd.xlane.f32.xlu0 %v1277_v2 }
 0x432   : > { %v1484_v3 = vpop.xlane.xlu2 %1483 }
 0x433   : > { %v1488_v4 = vsub.f32 %v1480_v59, %v1484_v3 }
 0x435   : > { %v1490_v5 = vmul.f32 1.442695, %v1488_v4 }
 0x437   : > { %2491 = vpow2.f32 %v1490_v5  ;;  %v1453_v7 = vpop.permute.xlu1 %1452 }
 0x43a   : > { %v1339_v6 = vpop.permute.xlu2 %1338 }
 0x43b   : > { %1359 = vmatpush.msra.mxu0 %v1339_v6 }
 0x43d   : > { %2330 = vmatpush.xpose.msk.msrb.mxu0 %vm1045_vm2, %v1453_v7  ;;  %v2492_v23 = vpop.eup %2491 }
 0x43e   : > { %v1494_v8 = vsel %vm1045_vm2, %v2492_v23, 0.0 }
 0x43f   : > { %1495 = vadd.xlane.f32.xlu1 %v1494_v8 }
 0x440   : > { %1530 = vrot.lane.b32.xlu0 %v3227_v26, %s2812_s9 }
 0x442   : > { %v1451_v27 = vpop.permute.xlu2 %1450 }
 0x448   : > { %1615 = vrot.lane.b32.xlu0 %v3208_v19, %s2813_s24 }
 0x44a   : > { %v1642_v44 = vpop.permute.xlu2 %1641 }
 0x450   : > { %1613 = vrot.lane.b32.xlu0 %v3210_v21, %s2813_s24 }
 0x458   : > { %1643 = vrot.lane.b32.xlu1 %v3236_v29, %s2813_s24 }
 0x470   : > { %v3312_v53 = vpop.f32.mrf.mxu2 }
 0x49f   : > { %v1279_v10 = vpop.xlane.xlu0 %1278 }
 0x4a0   : > { %2493 = vrcp.f32 %v1279_v10  ;;  %v1306_v15 = vand.u32 2147483648, %v1279_v10  ;;  %v1304_v17 = vand.u32 2147483647, %v1279_v10  ;;  %vm1300_vm0 = vweird.f32 %v1279_v10 }
 0x4a2   : > { %v1307_v20 = vor.u32 1.1754944e-38, %v1306_v15  ;;  %vm1305_vm4 = vcmp.eq.f32.partialorder %v1304_v17, 8.507059e+37 }
 0x4a6   : > { %v2494_v12 = vpop.eup %2493 }
 0x4a7   : > { %v1296_v13 = vmul.f32 %v2494_v12, %v1279_v10  ;;  %vm1301_vm15 = vweird.f32 %v2494_v12 }
 0x4a8   : > { %vm1302_vm3 = vmor %vm1300_vm0, %vm1301_vm15 }
 0x4a9   : > { %v1297_v14 = vsub.f32 1.0, %v1296_v13  ;;  %v2460_v13 = vpack.i.bf16 %v3257_v52, %v3227_v26 }
 0x4ab   : > { %v1298_v16 = vmul.f32 %v2494_v12, %v1297_v14 }
 0x4ad   : > { %v1299_v18 = vadd.f32 %v2494_v12, %v1298_v16 }
 0x4af   : > { %v1303_v19 = vsel %vm1302_vm3, %v2494_v12, %v1299_v18 }
 0x4b0   : > { %v1308_v22 = vsel %vm1305_vm4, %v1307_v20, %v1303_v19 }
 0x4b1   : > { %v1309_v21 = vmul.f32 %v2490_v1, %v1308_v22 }
 0x4b2   : > { %v1496_v24 = vpop.xlane.xlu1 %1495  ;;  %v1531_v25 = vpop.permute.xlu0 %1530 }
 0x4b3   : > { %2495 = vrcp.f32 %v1496_v24  ;;  %2323 = vmatmul.msk.f32.vlgmr.msra.gmra.mxu0 %vm1045_vm2, %v1309_v21  ;;  %1551 = vmatpush.msrb.mxu3 %v1531_v25  ;;  %v1511_v33 = vand.u32 2147483648, %v1496_v24  ;;  %v1509_v35 = vand.u32 2147483647, %v1496_v24  ;;  %vm1505_vm6 = vweird.f32 %v1496_v24 }
 0x4b5   : > { %v1512_v37 = vor.u32 1.1754944e-38, %v1511_v33  ;;  %vm1510_vm8 = vcmp.eq.f32.partialorder %v1509_v35, 8.507059e+37 }
 0x4b9   : > { %v2496_v29 = vpop.eup %2495 }
 0x4ba   : > { %v1501_v28 = vmul.f32 %v2496_v29, %v1496_v24  ;;  %v1616_v30 = vpop.permute.xlu0 %1615  ;;  %vm1506_vm5 = vweird.f32 %v2496_v29 }
 0x4bb   : > { %2331 = vmatmul.msk.f32.vlgmr.msrb.gmra.mxu0 %vm1045_vm2, %v1451_v27  ;;  %2336 = vmatpush.xpose.msk.msra.mxu2 %vm1045_vm2, %v1616_v30  ;;  %vm1507_vm7 = vmor %vm1505_vm6, %vm1506_vm5 }
 0x4bc   : > { %v1502_v31 = vsub.f32 1.0, %v1501_v28 }
 0x4be   : > { %v1503_v34 = vmul.f32 %v2496_v29, %v1502_v31 }
 0x4c0   : > { %v1504_v36 = vadd.f32 %v2496_v29, %v1503_v34 }
 0x4c2   : > { %v1508_v38 = vsel %vm1507_vm7, %v2496_v29, %v1504_v36  ;;  %v1614_v40 = vpop.permute.xlu0 %1613 }
 0x4c3   : > { %v1513_v41 = vsel %vm1510_vm8, %v1512_v37, %v1508_v38  ;;  %2337 = vmatmul.msk.f32.vlgmr.msra.gmra.mxu2 %vm1045_vm2, %v1614_v40 }
 0x4c4   : > { %v1514_v42 = vmul.f32 %v2492_v23, %v1513_v41 }
 0x4c6   : > { %2332 = vmatmul.msk.f32.vlgmr.msrb.gmra.mxu3 %vm1045_vm2, %v1514_v42 }
 0x4ca   : > { %v1644_v43 = vpop.permute.xlu1 %1643 }
 0x4cb   : > { %2338 = vmatpush.xpose.msk.msra.mxu3 %vm1045_vm2, %v1644_v43 }
 0x4ce   : > { %2339 = vmatmul.msk.f32.vlgmr.msra.gmra.mxu3 %vm1045_vm2, %v1642_v44 }
 0x530   : > { %v1361_v46 = vpop.f32.mrf.mxu0 }
 0x531   : > { %2325 = vmatmul.msk.f32.gmra.mxu1 %vm1045_vm2, %v1361_v46 }
 0x538   : > { %v1475_v48 = vpop.f32.mrf.mxu0 }
 0x539   : > { %v1479_v49 = vmul.f32 0.35355338, %v1475_v48 }
 0x53b   : > { %v1481_v50 = vadd.f32 %v3248_v39, %v1479_v49 }
 0x53d   : > { %v1485_v51 = vsel %vm1045_vm2, %v1481_v50, -inf }
 0x53e   : > { %1486 = vmax.xlane.f32.xlu1 %v1485_v51 }
 0x546   : > { %v1638_v54 = vpop.f32.mrf.mxu2 }
 0x547   : > { %v1669_v55 = vmul.f32 0.35355338, %v1638_v54 }
 0x549   : > { %v1553_v56 = vpop.f32.mrf.mxu3  ;;  %v1671_v57 = vadd.f32 %v3244_v32, %v1669_v55 }
 0x54a   : > { %2334 = vmatmul.msk.f32.vlgmr.msrb.gmra.mxu1 %vm1045_vm2, %v1553_v56 }
 0x54b   : > { %v1673_v58 = vsel %vm1045_vm2, %v1671_v57, -inf }
 0x54c   : > { %1674 = vmax.xlane.f32.xlu0 %v1673_v58 }
 0x551   : > { %v1666_v59 = vpop.f32.mrf.mxu3 }
 0x552   : > { %v1670_v60 = vmul.f32 0.35355338, %v1666_v59  ;;  %v1044_v59 = vld [vmem:[%s3165_s5 + $0x18] sm:$0xff] }
 0x553   : > { %1794 = vmatpush.msrb.mxu3 %v1044_v59  ;;  %v2472_v59 = vld [vmem:[%s761_s29] ss:$0 sm:$0xff] }
 0x554   : > { %v1672_v61 = vadd.f32 %v3248_v39, %v1670_v60 }
 0x556   : > { %v1676_v62 = vsel %vm1045_vm2, %v1672_v61, -inf }
 0x557   : > { %1677 = vmax.xlane.f32.xlu2 %v1676_v62 }
 0x5b1   : > { %v1487_v63 = vpop.xlane.xlu1 %1486 }
 0x5b2   : > { %v1489_v0 = vsub.f32 %v1481_v50, %v1487_v63  ;;  %v1387_v63 = vpop.f32.mrf.mxu1 }
 0x5b4   : > { %v1492_v1 = vmul.f32 1.442695, %v1489_v0 }
 0x5b6   : > { %2497 = vpow2.f32 %v1492_v1 }
 0x5ba   : > { %v1390_v0 = vpop.f32.mrf.mxu1 }
 0x5bc   : > { %v2498_v2 = vpop.eup %2497 }
 0x5bd   : > { %v1497_v3 = vsel %vm1045_vm2, %v2498_v2, 0.0 }
 0x5be   : > { %1498 = vadd.xlane.f32.xlu1 %v1497_v3 }
 0x5bf   : > { %v1675_v32 = vpop.xlane.xlu0 %1674 }
 0x5c0   : > { %v1679_v4 = vsub.f32 %v1671_v57, %v1675_v32  ;;  %v2470_v32 = vld [vmem:[%s3503_s30] ss:$0 sm:$0xff] }
 0x5c2   : > { %v1681_v5 = vmul.f32 1.442695, %v1679_v4 }
 0x5c4   : > { %2499 = vpow2.f32 %v1681_v5 }
 0x5c7   : > { %v1605_v1 = vpop.f32.mrf.mxu1 }
 0x5ca   : > { %v2500_v6 = vpop.eup %2499  ;;  %v1678_v7 = vpop.xlane.xlu2 %1677 }
 0x5cb   : > { %v1680_v23 = vsub.f32 %v1672_v61, %v1678_v7  ;;  %v1685_v39 = vsel %vm1045_vm2, %v2500_v6, 0.0 }
 0x5cc   : > { %1686 = vadd.xlane.f32.xlu0 %v1685_v39 }
 0x5cd   : > { %v1683_v8 = vmul.f32 1.442695, %v1680_v23 }
 0x5cf   : > { %2501 = vpow2.f32 %v1683_v8  ;;  %v1420_v8 = vadd.f32 %v3312_v53, %v1390_v0 }
 0x5d5   : > { %v3321_v10 = vpop.eup %2501 }
 0x5d6   : > { %v1688_v12 = vsel %vm1045_vm2, %v3321_v10, 0.0 }
 0x5d7   : > { %1556 = vrot.lane.b32.xlu1 %v3257_v52, %s2812_s9  ;;  %1689 = vadd.xlane.f32.xlu2 %v1688_v12 }
 0x5e0   : > { %2461 = vrot.lane.b32.xlu0 %v2460_v13, %s2813_s24 }
 0x631   : > { %v1499_v14 = vpop.xlane.xlu1 %1498 }
 0x632   : > { %2503 = vrcp.f32 %v1499_v14  ;;  %v1526_v22 = vand.u32 2147483648, %v1499_v14  ;;  %vm1520_vm10 = vweird.f32 %v1499_v14  ;;  %v1524_v21 = vand.u32 2147483647, %v1499_v14 }
 0x634   : > { %v1527_v25 = vor.u32 1.1754944e-38, %v1526_v22  ;;  %vm1525_vm12 = vcmp.eq.f32.partialorder %v1524_v21, 8.507059e+37 }
 0x638   : > { %v2504_v15 = vpop.eup %2503 }
 0x639   : > { %v1516_v16 = vmul.f32 %v2504_v15, %v1499_v14  ;;  %vm1521_vm9 = vweird.f32 %v2504_v15 }
 0x63a   : > { %vm1522_vm11 = vmor %vm1520_vm10, %vm1521_vm9 }
 0x63b   : > { %v1517_v17 = vsub.f32 1.0, %v1516_v16  ;;  %v2814_v16 = vmov 32.0  }
 0x63d   : > { %v1518_v18 = vmul.f32 %v2504_v15, %v1517_v17 }
 0x63f   : > { %v1519_v20 = vadd.f32 %v2504_v15, %v1518_v18  ;;  %v1687_v19 = vpop.xlane.xlu0 %1686 }
 0x640   : > { %2505 = vrcp.f32 %v1687_v19  ;;  %v1702_v34 = vand.u32 2147483648, %v1687_v19  ;;  %v1700_v35 = vand.u32 2147483647, %v1687_v19  ;;  %vm1696_vm14 = vweird.f32 %v1687_v19 }
 0x641   : > { %v1523_v24 = vsel %vm1522_vm11, %v2504_v15, %v1519_v20 }
 0x642   : > { %v1528_v52 = vsel %vm1525_vm12, %v1527_v25, %v1523_v24  ;;  %v1703_v38 = vor.u32 1.1754944e-38, %v1702_v34  ;;  %vm1701_vm0 = vcmp.eq.f32.partialorder %v1700_v35, 8.507059e+37  ;;  %v1875_v34 = vld [vmem:[%s3168_s6] sm:$0xff] }
 0x643   : > { %v1529_v30 = vmul.f32 %v2498_v2, %v1528_v52  ;;  %v1417_v2 = vadd.f32 %v3308_v47, %v1387_v63 }
 0x645   : > { %v1611_v3 = vadd.f32 %v1605_v1, %v1417_v2 }
 0x646   : > { %v2506_v26 = vpop.eup %2505 }
 0x647   : > { %v1692_v29 = vmul.f32 %v2506_v26, %v1687_v19  ;;  %vm1697_vm13 = vweird.f32 %v2506_v26 }
 0x648   : > { %vm1698_vm15 = vmor %vm1696_vm14, %vm1697_vm13  ;;  %vm1926_vm13 = vcmask 523264  }
 0x649   : > { %v1693_v27 = vsub.f32 1.0, %v1692_v29  ;;  %v1557_v28 = vpop.permute.xlu1 %1556 }
 0x64a   : > { %1577 = vmatpush.msra.mxu0 %v1557_v28  ;;  %v1690_v31 = vpop.xlane.xlu2 %1689 }
 0x64b   : > { %v1694_v33 = vmul.f32 %v2506_v26, %v1693_v27  ;;  %2507 = vrcp.f32 %v1690_v31  ;;  %2333 = vmatmul.msk.f32.vlgmr.msra.gmra.mxu0 %vm1045_vm2, %v1529_v30  ;;  %v1717_v49 = vand.u32 2147483648, %v1690_v31  ;;  %v1715_v51 = vand.u32 2147483647, %v1690_v31  ;;  %v1878_v30 = vld [vmem:[%s3168_s6 + $0x18] sm:$0xff] }
 0x64c   : > { %vm1711_vm4 = vweird.f32 %v1690_v31  ;;  %2509 = vrcp.f32 %v2814_v16  ;;  %v2474_v16 = vld [vmem:[%s924_s10] ss:$0 sm:$0xff] }
 0x64d   : > { %v1695_v36 = vadd.f32 %v2506_v26, %v1694_v33  ;;  %v1718_v55 = vor.u32 1.1754944e-38, %v1717_v49  ;;  %vm1716_vm6 = vcmp.eq.f32.partialorder %v1715_v51, 8.507059e+37  ;;  %v1876_v33 = vld [vmem:[%s3168_s6 + $0x8] sm:$0xff]  ;;  %v1917_v51 = vld [vmem:[%s3155_s26 + $0x18] sm:$0xff] }
 0x64f   : > { %v1699_v37 = vsel %vm1698_vm15, %v2506_v26, %v1695_v36 }
 0x650   : > { %v1704_v41 = vsel %vm1701_vm0, %v1703_v38, %v1699_v37 }
 0x651   : > { %v2508_v40 = vpop.eup %2507  ;;  %v1705_v48 = vmul.f32 %v2500_v6, %v1704_v41  ;;  %v1920_v41 = vld [vmem:[%s3155_s26 + $0x30] sm:$0xff] }
 0x652   : > { %v1707_v42 = vmul.f32 %v2508_v40, %v1690_v31  ;;  %v2462_v43 = vpop.permute.xlu0 %2461  ;;  %vm1712_vm3 = vweird.f32 %v2508_v40  ;;  %v2510_v17 = vpop.eup %2509  ;;  %v1877_v31 = vld [vmem:[%s3168_s6 + $0x10] sm:$0xff] }
 0x653   : > { %v2464_v44 = vunpack.i.h.bf16 %v2462_v43  ;;  %v2463_v45 = vunpack.i.l.bf16 %v2462_v43  ;;  %vm1713_vm5 = vmor %vm1711_vm4, %vm1712_vm3  ;;  %v1819_v18 = vmul.f32 32.0, %v2510_v17  ;;  %v1919_v43 = vld [vmem:[%s3155_s26 + $0x28] sm:$0xff] }
 0x654   : > { %v1708_v46 = vsub.f32 1.0, %v1707_v42 }
 0x655   : > { %1742 = vmatpush.msrb.mxu0 %v2463_v45  ;;  %1768 = vmatpush.msrb.mxu2 %v2464_v44 }
 0x656   : > { %v1709_v50 = vmul.f32 %v2508_v40, %v1708_v46  ;;  %2340 = vmatmul.msk.f32.vlgmr.msrb.gmra.mxu0 %vm1045_vm2, %v1705_v48  ;;  %v1918_v48 = vld [vmem:[%s3155_s26 + $0x20] sm:$0xff] }
 0x657   : > { %1901 = vmatpush.msra.mxu0 %v1878_v30 }
 0x658   : > { %v1710_v54 = vadd.f32 %v2508_v40, %v1709_v50 }
 0x659   : > { %1902 = vmatpush.msra.mxu0 %v1877_v31 }
 0x65a   : > { %v1714_v56 = vsel %vm1713_vm5, %v2508_v40, %v1710_v54  ;;  %v1921_v40 = vld [vmem:[%s3155_s26 + $0x38] sm:$0xff] }
 0x65b   : > { %v1719_v57 = vsel %vm1716_vm6, %v1718_v55, %v1714_v56  ;;  %1903 = vmatpush.msra.mxu0 %v1876_v33  ;;  %1941 = vmatpush.msra.mxu1 %v1921_v40  ;;  %v2471_v56 = vld [vmem:[%s913_s8] ss:$0 sm:$0xff] }
 0x65c   : > { %v1720_v58 = vmul.f32 %v3321_v10, %v1719_v57 }
 0x65d   : > { %1904 = vmatpush.msra.mxu0 %v1875_v34  ;;  %1942 = vmatpush.msra.mxu1 %v1920_v41 }
 0x65e   : > { %2341 = vmatmul.msk.f32.vlgmr.msrb.gmra.mxu2 %vm1045_vm2, %v1720_v58 }
 0x65f   : > { %1943 = vmatpush.msra.mxu1 %v1919_v43 }
 0x661   : > { %1944 = vmatpush.msra.mxu1 %v1918_v48  ;;  %v2475_v48 = vld [vmem:[%s927_s18] ss:$0 sm:$0xff] }
 0x663   : > { %1945 = vmatpush.msra.mxu1 %v1917_v51 }
 0x6c8   : > { %v1579_v60 = vpop.f32.mrf.mxu0 }
 0x6c9   : > { %2335 = vmatmul.msk.f32.gmra.mxu1 %vm1045_vm2, %v1579_v60 }
 0x6d3   : > { %v1744_v61 = vpop.f32.mrf.mxu0 }
 0x6d4   : > { %2342 = vmatmul.msk.f32.vlgmr.msrb.gmra.mxu3 %vm1045_vm2, %v1744_v61 }
 0x6e1   : > { %v1770_v62 = vpop.f32.mrf.mxu2 }
 0x6e2   : > { %2343 = vmatmul.msk.f32.gmra.mxu3 %vm1045_vm2, %v1770_v62  ;;  %vm1823_vm2 = vweird.f32 %v2510_v17 }
 0x746   : > { %v1608_v39 = vpop.f32.mrf.mxu1 }
 0x747   : > { %v1612_v10 = vadd.f32 %v1608_v39, %v1420_v8  ;;  %v1914_v39 = vld [vmem:[%s3155_s26] sm:$0xff] }
 0x748   : > { %v2473_v8 = vld [vmem:[%s916_s4] ss:$0 sm:$0xff] }
 0x757   : > { %v1796_v4 = vpop.f32.mrf.mxu3 }
 0x758   : > { %v1802_v5 = vadd.f32 %v1796_v4, %v1611_v3 }
 0x75a   : > { %v1808_v6 = vadd.f32 %v2470_v32, %v1802_v5 }
 0x75c   : > { %v1810_v7 = vadd.f32 %v1808_v6, %v3180_v9  ;;  %v1820_v9 = vsub.f32 1.0, %v1819_v18 }
 0x75e   : > { %v1812_v23 = vsel %vm949_vm1, %v1810_v7, 0.0  ;;  %v1821_v20 = vmul.f32 %v2510_v17, %v1820_v9 }
 0x75f   : > { %1813 = vadd.xlane.f32.xlu2 %v1812_v23  ;;  %v1915_v23 = vld [vmem:[%s3155_s26 + $0x8] sm:$0xff] }
 0x760   : > { %v1822_v19 = vadd.f32 %v2510_v17, %v1821_v20 }
 0x762   : > { %v3349_v53 = vsel %vm1823_vm2, %v2510_v17, %v1822_v19 }
 0x765   : > { %v1799_v12 = vpop.f32.mrf.mxu3 }
 0x766   : > { %v1803_v47 = vadd.f32 %v1799_v12, %v1612_v10 }
 0x768   : > { %v1809_v13 = vadd.f32 %v2470_v32, %v1803_v47 }
 0x76a   : > { %v1811_v14 = vadd.f32 %v1809_v13, %v3183_v11 }
 0x76c   : > { %v1815_v15 = vsel %vm949_vm1, %v1811_v14, 0.0 }
 0x76d   : > { %1816 = vadd.xlane.f32.xlu2 %v1815_v15 }
 0x7d2   : > { %v1814_v22 = vpop.xlane.xlu2 %1813 }
 0x7d3   : > { %v1825_v21 = vmul.f32 %v3349_v53, %v1814_v22 }
 0x7d5   : > { %v1827_v11 = vsub.f32 %v1810_v7, %v1825_v21  ;;  %v1916_v7 = vld [vmem:[%s3155_s26 + $0x10] sm:$0xff] }
 0x7d6   : > { %1946 = vmatpush.msra.mxu1 %v1916_v7 }
 0x7d7   : > { %v1829_v24 = vmul.f32 %v1827_v11, %v1827_v11 }
 0x7d8   : > { %1947 = vmatpush.msra.mxu1 %v1915_v23 }
 0x7d9   : > { %v1831_v25 = vsel %vm949_vm1, %v1829_v24, 0.0 }
 0x7da   : > { %1832 = vadd.xlane.f32.xlu2 %v1831_v25  ;;  %1948 = vmatpush.msra.mxu1 %v1914_v39 }
 0x7e0   : > { %v1817_v26 = vpop.xlane.xlu2 %1816 }
 0x7e1   : > { %v1826_v52 = vmul.f32 %v3349_v53, %v1817_v26 }
 0x7e3   : > { %v1828_v29 = vsub.f32 %v1811_v14, %v1826_v52 }
 0x7e5   : > { %v1830_v27 = vmul.f32 %v1828_v29, %v1828_v29 }
 0x7e7   : > { %v1834_v28 = vsel %vm949_vm1, %v1830_v27, 0.0 }
 0x7e8   : > { %1835 = vadd.xlane.f32.xlu0 %v1834_v28 }
 0x84d   : > { %v1833_v35 = vpop.xlane.xlu2 %1832 }
 0x84e   : > { %v1837_v36 = vmul.f32 %v1833_v35, %v3349_v53 }
 0x850   : > { %v1839_v37 = vadd.f32 1e-05, %v1837_v36 }
 0x852   : > { %2511 = vrsqrt.f32 %v1839_v37  ;;  %vm1847_vm8 = vweird.f32 %v1839_v37 }
 0x858   : > { %v2512_v38 = vpop.eup %2511 }
 0x859   : > { %v1842_v42 = vmul.f32 %v2512_v38, %v1839_v37  ;;  %vm1848_vm7 = vweird.f32 %v2512_v38 }
 0x85a   : > { %vm1849_vm9 = vmor %vm1847_vm8, %vm1848_vm7 }
 0x85b   : > { %v1843_v44 = vmul.f32 %v2512_v38, %v1842_v42  ;;  %v1836_v45 = vpop.xlane.xlu0 %1835 }
 0x85c   : > { %v1838_v46 = vmul.f32 %v1836_v45, %v3349_v53 }
 0x85d   : > { %v1844_v49 = vmul.f32 0.5, %v1843_v44 }
 0x85e   : > { %v1840_v50 = vadd.f32 1e-05, %v1838_v46 }
 0x85f   : > { %v1845_v54 = vsub.f32 1.5, %v1844_v49 }
 0x860   : > { %2513 = vrsqrt.f32 %v1840_v50  ;;  %vm1857_vm11 = vweird.f32 %v1840_v50 }
 0x861   : > { %v1846_v55 = vmul.f32 %v2512_v38, %v1845_v54 }
 0x863   : > { %v1850_v57 = vsel %vm1849_vm9, %v2512_v38, %v1846_v55 }
 0x864   : > { %v1861_v58 = vmul.f32 %v1850_v57, %v1827_v11 }
 0x866   : > { %v2514_v60 = vpop.eup %2513  ;;  %v1867_v61 = vmul.f32 %v2471_v56, %v1861_v58 }
 0x867   : > { %v1852_v62 = vmul.f32 %v2514_v60, %v1840_v50  ;;  %vm1858_vm10 = vweird.f32 %v2514_v60  ;;  %v2476_v50 = vld [vmem:[%s780_s2] ss:$0 sm:$0xff] }
 0x868   : > { %v1873_v63 = vadd.f32 %v2472_v59, %v1867_v61  ;;  %vm1859_vm12 = vmor %vm1857_vm11, %vm1858_vm10 }
 0x869   : > { %v1853_v0 = vmul.f32 %v2514_v60, %v1852_v62 }
 0x86a   : > { %2344 = vmatmul.msk.f32.vlgmr.msra.gmra.mxu0 %vm949_vm1, %v1873_v63 }
 0x86b   : > { %v1854_v1 = vmul.f32 0.5, %v1853_v0 }
 0x86d   : > { %v1855_v2 = vsub.f32 1.5, %v1854_v1 }
 0x86f   : > { %v1856_v3 = vmul.f32 %v2514_v60, %v1855_v2 }
 0x871   : > { %v1860_v32 = vsel %vm1859_vm12, %v2514_v60, %v1856_v3 }
 0x872   : > { %v1862_v4 = vmul.f32 %v1860_v32, %v1828_v29 }
 0x874   : > { %v1868_v5 = vmul.f32 %v2471_v56, %v1862_v4 }
 0x876   : > { %v1874_v6 = vadd.f32 %v2472_v59, %v1868_v5 }
 0x878   : > { %2345 = vmatmul.msk.f32.gmra.mxu0 %vm949_vm1, %v1874_v6 }
 0x8e7   : > { %v1906_v10 = vpop.f32.mrf.mxu0 }
 0x8e8   : > { %v1907_v12 = vadd.f32 %v2473_v8, %v1906_v10 }
 0x8ea   : > { %v1912_v47 = vmax.f32 %v1907_v12, 0.0 }
 0x8ec   : > { %2346 = vmatmul.msk.f32.vlgmr.msra.gmra.mxu1 %vm1926_vm13, %v1912_v47 }
 0x8f5   : > { %v1909_v13 = vpop.f32.mrf.mxu0 }
 0x8f6   : > { %v1910_v14 = vadd.f32 %v2473_v8, %v1909_v13 }
 0x8f8   : > { %v1913_v15 = vmax.f32 %v1910_v14, 0.0 }
 0x8fa   : > { %2347 = vmatmul.msk.f32.gmra.mxu1 %vm1926_vm13, %v1913_v15 }
 0x969   : > { %v1950_v17 = vpop.f32.mrf.mxu1 }
 0x96a   : > { %v1951_v18 = vadd.f32 %v2474_v16, %v1950_v17 }
 0x96c   : > { %v1956_v9 = vadd.f32 %v1951_v18, %v1873_v63 }
 0x96e   : > { %v1958_v20 = vsel %vm949_vm1, %v1956_v9, 0.0 }
 0x96f   : > { %1959 = vadd.xlane.f32.xlu1 %v1958_v20 }
 0x977   : > { %v1953_v19 = vpop.f32.mrf.mxu1 }
 0x978   : > { %v1954_v22 = vadd.f32 %v2474_v16, %v1953_v19 }
 0x97a   : > { %v1957_v21 = vadd.f32 %v1954_v22, %v1874_v6 }
 0x97c   : > { %v1961_v11 = vsel %vm949_vm1, %v1957_v21, 0.0 }
 0x97d   : > { %1962 = vadd.xlane.f32.xlu2 %v1961_v11 }
 0x9e2   : > { %v1960_v24 = vpop.xlane.xlu1 %1959 }
 0x9e3   : > { %v1964_v25 = vmul.f32 %v1960_v24, %v3349_v53 }
 0x9e5   : > { %v1966_v26 = vsub.f32 %v1956_v9, %v1964_v25 }
 0x9e7   : > { %v1968_v52 = vmul.f32 %v1966_v26, %v1966_v26 }
 0x9e9   : > { %v1970_v29 = vsel %vm949_vm1, %v1968_v52, 0.0 }
 0x9ea   : > { %1971 = vadd.xlane.f32.xlu2 %v1970_v29 }
 0x9f0   : > { %v1963_v27 = vpop.xlane.xlu2 %1962 }
 0x9f1   : > { %v1965_v28 = vmul.f32 %v1963_v27, %v3349_v53 }
 0x9f3   : > { %v1967_v30 = vsub.f32 %v1957_v21, %v1965_v28 }
 0x9f5   : > { %v1969_v31 = vmul.f32 %v1967_v30, %v1967_v30 }
 0x9f7   : > { %v1973_v33 = vsel %vm949_vm1, %v1969_v31, 0.0 }
 0x9f8   : > { %1974 = vadd.xlane.f32.xlu2 %v1973_v33 }
 0xa5d   : > { %v1972_v34 = vpop.xlane.xlu2 %1971 }
 0xa5e   : > { %v1976_v35 = vmul.f32 %v1972_v34, %v3349_v53 }
 0xa60   : > { %v1978_v36 = vadd.f32 1e-05, %v1976_v35 }
 0xa62   : > { %2515 = vrsqrt.f32 %v1978_v36  ;;  %vm1986_vm15 = vweird.f32 %v1978_v36 }
 0xa68   : > { %v2516_v37 = vpop.eup %2515 }
 0xa69   : > { %v1981_v38 = vmul.f32 %v2516_v37, %v1978_v36  ;;  %vm1987_vm14 = vweird.f32 %v2516_v37 }
 0xa6a   : > { %vm1988_vm0 = vmor %vm1986_vm15, %vm1987_vm14 }
 0xa6b   : > { %v1982_v40 = vmul.f32 %v2516_v37, %v1981_v38  ;;  %v1975_v41 = vpop.xlane.xlu2 %1974 }
 0xa6c   : > { %v1977_v42 = vmul.f32 %v1975_v41, %v3349_v53 }
 0xa6d   : > { %v1983_v43 = vmul.f32 0.5, %v1982_v40 }
 0xa6e   : > { %v1979_v44 = vadd.f32 1e-05, %v1977_v42 }
 0xa6f   : > { %v1984_v45 = vsub.f32 1.5, %v1983_v43 }
 0xa70   : > { %2517 = vrsqrt.f32 %v1979_v44  ;;  %vm1996_vm4 = vweird.f32 %v1979_v44 }
 0xa71   : > { %v1985_v46 = vmul.f32 %v2516_v37, %v1984_v45 }
 0xa73   : > { %v1989_v49 = vsel %vm1988_vm0, %v2516_v37, %v1985_v46 }
 0xa74   : > { %v2000_v51 = vmul.f32 %v1989_v49, %v1966_v26 }
 0xa76   : > { %v2518_v54 = vpop.eup %2517  ;;  %v2006_v55 = vmul.f32 %v2475_v48, %v2000_v51 }
 0xa77   : > { %v1991_v53 = vmul.f32 %v2518_v54, %v1979_v44  ;;  %vm1997_vm3 = vweird.f32 %v2518_v54 }
 0xa78   : > { %v2012_v56 = vadd.f32 %v2476_v50, %v2006_v55  ;;  %vm1998_vm5 = vmor %vm1996_vm4, %vm1997_vm3 }
 0xa79   : > { %v1992_v57 = vmul.f32 %v2518_v54, %v1991_v53 }
 0xa7a   : > { %2014 = vst.msk [vmem:[#allocation2] sm:$0xff] %vm949_vm1, %v2012_v56 }
 0xa7b   : > { %v1993_v58 = vmul.f32 0.5, %v1992_v57 }
 0xa7d   : > { %v1994_v59 = vsub.f32 1.5, %v1993_v58 }
 0xa7f   : > { %v1995_v60 = vmul.f32 %v2518_v54, %v1994_v59 }
 0xa81   : > { %v1999_v61 = vsel %vm1998_vm5, %v2518_v54, %v1995_v60 }
 0xa82   : > { %v2001_v62 = vmul.f32 %v1999_v61, %v1967_v30 }
 0xa84   : > { %v2007_v63 = vmul.f32 %v2475_v48, %v2001_v62  ;;  %2019 = sbr.rel (%p2348_p1) target bundleno = 2699 (0xa8b), region = 128 }
 0xa86   : > { %v2013_v0 = vadd.f32 %v2476_v50, %v2007_v63 }
 0xa88   : > { %2015 = vst.msk [vmem:[#allocation2 + $0x8] sm:$0xff] %vm949_vm1, %v2013_v0 }
 0xa89   : > { %2020 = vst.msk [vmem:[#allocation13] sm:$0xff] %vm949_vm1, %v2012_v56 }
 0xa8a   : > { %2021 = vst.msk [vmem:[#allocation13 + $0x8] sm:$0xff] %vm949_vm1, %v2013_v0 }
 0xa8b PF: > { %p2413_p4 = scmp.eq.s32.totalorder %s2932_s0, 1  ;;  %s2815_s11 = smov [#allocation13]  }
 0xa8c   : > { %s2027_s15 = sshll.u32 %s2815_s11, 4  ;;  %s3508_s22 = sld [smem:[#allocation37_spill]]  ;;  %s2028_s15 = int_to_ptr.vmem [resolvable:$true] %s2027_s15 }
 0xa8d   : > { %s2816_s21 = smov 128   ;;  %s2817_s7 = smov 8  }
 0xa92   : > { %s2029_s13 = sshll.u32 %s3508_s22, 4  ;;  %s2030_s13 = int_to_ptr.hbm [resolvable:$true] %s2029_s13 }
 0xa93   : > { %2382 = dma.vmem_to_hbm [thread:$0]  (%p2413_p4), %s2028_s15, 256, %s2030_s13, [#allocation5], %s2816_s21, %s2816_s21, %s2817_s7  }
 0xa94   : > { %2786 = dma.done.wait (%p2413_p4), [#allocation5], 256  }
 0xa95   : > { %2788 = vsyncadd (%p2413_p4), [#allocation5], 4294967040 }
 0xa96 PF: > { %s3509_s30 = sld [smem:[#allocation19_spill]]  ;;  %s3512_s27 = smov %s2795_s28 }
 0xa97   : > { %s3510_s9 = sld [smem:[#allocation18_spill]] }
 0xa98   : > { %s3511_s29 = sld [smem:[#allocation20_spill]] }
 0xa9c   : > { %p28_p5 = scmp.ge.s32.totalorder %s3509_s30, 4  }
 0xa9d   : > { %s3513_s28 = smov %s3510_s9 }
 0xa9e   :  { %30 = sbr.rel (!%p28_p5) target bundleno = 22 (0x16), region = 221 }
 0xaa3   :  { %2046 = vsyncpa [#allocation4], 1 }
 0xaa4   :  { %2048 = vsyncpa [#allocation4 + $0x1], 1 }
 0xaa5   :  { %2049 = vsyncpa [#allocation7], 1 }
 0xaa6   :  { %2050 = vsyncpa [#allocation5], 1 }
 0xaa7   :  { %2052 = vsyncpa [#allocation5 + $0x1], 1 }

</bundles_post_ra>
